<compile_context>
chip_gen: v6e
topology: v6e:2x2x1
jax: 0.10.0
libtpu: 0.0.40
codegen_flags: <defaults>
</compile_context>

<pallas_src>
import jax
import jax.numpy as jnp
from jax.experimental import pallas as pl
from jax.experimental.pallas import tpu as pltpu


def mlp_policy_kernel(x_ref, w1_ref, b1_ref, w2_ref, b2_ref, w3_ref, b3_ref, o_ref):
    # Cast activations to bf16 only at the MXU inputs; accumulate/elementwise in f32.
    x = x_ref[...].astype(jnp.bfloat16)

    # fc1 + ReLU
    h1 = jnp.dot(x, w1_ref[...], preferred_element_type=jnp.float32) + b1_ref[...]
    h1 = jnp.maximum(h1, 0.0).astype(jnp.bfloat16)

    # fc2 + ReLU
    h2 = jnp.dot(h1, w2_ref[...], preferred_element_type=jnp.float32) + b2_ref[...]
    h2 = jnp.maximum(h2, 0.0).astype(jnp.bfloat16)

    # fc3 + softmax over the feature axis (dim=1), f32 throughout.
    # Padded output columns carry a -1e30 bias -> exp underflows to exactly 0,
    # so they contribute nothing to the normalization and the real columns are
    # the exact softmax over the original 140 logits.
    logits = jnp.dot(h2, w3_ref[...], preferred_element_type=jnp.float32) + b3_ref[...]
    m = jnp.max(logits, axis=1, keepdims=True)
    e = jnp.exp(logits - m)
    denom = jnp.sum(e, axis=1, keepdims=True)
    o_ref[...] = e * pl.reciprocal(denom, approx=False)


def _round_up(n, m):
    return ((n + m - 1) // m) * m


def _num_tensorcores():
    """Best-effort TensorCores-per-chip (v7x has 2). Safe fallback: 1."""
    try:
        info = pltpu.get_tpu_info()
    except Exception:
        return 1
    for attr in ("num_cores", "tensor_cores_per_chip", "num_tensorcores", "core_count"):
        n = getattr(info, attr, None)
        if isinstance(n, int) and n > 0:
            return n
    return 1


def prepare_params(params):
    """One-time prep of PyTorch-convention params ([out,in] W, [out] b).

    * Weights transposed to [in,out] and stored bf16 (halves weight DMA bytes).
    * Input feature dim padded up to a multiple of 128 with ZERO rows.
    * Output dim padded up to a multiple of 128: zero weight columns plus a
      -1e30 bias in the padded columns so softmax mass there is exactly 0.
    * Biases stored as [1,out] f32.
    """
    I = params["w1"].shape[1]
    H = params["w1"].shape[0]
    O = params["w3"].shape[0]
    I_pad = _round_up(I, 128)
    O_pad = _round_up(O, 128)

    w1t = params["w1"].T.astype(jnp.float32)                 # [I, H]
    w1t = jnp.pad(w1t, ((0, I_pad - I), (0, 0)))              # zero rows
    w3t = params["w3"].T.astype(jnp.float32)                  # [H, O]
    w3t = jnp.pad(w3t, ((0, 0), (0, O_pad - O)))               # zero cols
    b3 = jnp.pad(params["b3"].astype(jnp.float32), (0, O_pad - O),
                 constant_values=-1e30)                        # padded logits -> -inf-ish

    return {
        "w1t": w1t.astype(jnp.bfloat16),
        "w2t": params["w2"].T.astype(jnp.bfloat16),
        "w3t": w3t.astype(jnp.bfloat16),
        "b1": params["b1"].reshape(1, -1).astype(jnp.float32),
        "b2": params["b2"].reshape(1, -1).astype(jnp.float32),
        "b3": b3.reshape(1, -1),
    }


def neural_net_policy_forward(x, prep, *, output_size=None, max_block_batch=1024):
    """x: [B, input_size] float32 (or bf16). prep: output of prepare_params."""
    B, I = x.shape
    I_pad, H = prep["w1t"].shape
    O_pad = prep["w3t"].shape[1]
    if output_size is None:
        output_size = O_pad

    # One-time zero-pad of the feature dim to the lane-aligned width the
    # weights were prepared for (zero features x zero weight rows == no-op).
    if I < I_pad:
        x = jnp.pad(x, ((0, 0), (0, I_pad - I)))

    # Chip-aware batch tiling:
    #   single-TC (v5e/v6e): one grid step, tm = B  (no serial-loop overhead)
    #   multi-TC  (v7x):     one tile per core, "parallel" grid axis
    ncores = _num_tensorcores()
    if ncores <= 1 or B <= 8:
        tm = B
    else:
        tm = min(_round_up(pl.cdiv(B, ncores), 8), B)
    tm = min(tm, max_block_batch)          # cap per-step VMEM footprint for huge B
    if tm != B and tm % 8 != 0:
        tm = B
    grid = (pl.cdiv(B, tm),)

    x_spec = pl.BlockSpec((tm, I_pad), lambda i: (i, 0))
    out_spec = pl.BlockSpec((tm, O_pad), lambda i: (i, 0))
    # Constant block index => weights DMA'd once and stay VMEM-resident.
    w_spec = lambda shape: pl.BlockSpec(shape, lambda i: (0, 0))

    flops = 2 * B * (I_pad * H + H * H + H * O_pad)
    bytes_accessed = (
        x.size * x.dtype.itemsize
        + sum(int(v.size) * v.dtype.itemsize for v in prep.values())
        + B * O_pad * 4
    )
    cost = pl.CostEstimate(
        flops=flops, transcendentals=B * O_pad, bytes_accessed=bytes_accessed
    )

    out = pl.pallas_call(
        mlp_policy_kernel,
        out_shape=jax.ShapeDtypeStruct((B, O_pad), jnp.float32),
        grid=grid,
        in_specs=[
            x_spec,
            w_spec((I_pad, H)), w_spec((1, H)),
            w_spec((H, H)), w_spec((1, H)),
            w_spec((H, O_pad)), w_spec((1, O_pad)),
        ],
        out_specs=out_spec,
        compiler_params=pltpu.CompilerParams(dimension_semantics=("parallel",)),
        cost_estimate=cost,
    )(x, prep["w1t"], prep["b1"], prep["w2t"], prep["b2"], prep["w3t"], prep["b3"])

    # Drop the (exactly-zero) padded probability columns.
    return out[:, :output_size]


def init_params(key, input_size, hidden_size, output_size):
    """Deterministic init mimicking nn.Linear default (uniform +/- 1/sqrt(fan_in))."""
    ks = jax.random.split(key, 6)

    def lin(kw, kb, fan_in, fan_out):
        bound = 1.0 / jnp.sqrt(fan_in)
        w = jax.random.uniform(kw, (fan_out, fan_in), jnp.float32, -bound, bound)
        b = jax.random.uniform(kb, (fan_out,), jnp.float32, -bound, bound)
        return w, b

    w1, b1 = lin(ks[0], ks[1], input_size, hidden_size)
    w2, b2 = lin(ks[2], ks[3], hidden_size, hidden_size)
    w3, b3 = lin(ks[4], ks[5], hidden_size, output_size)
    return {"w1": w1, "b1": b1, "w2": w2, "b2": b2, "w3": w3, "b3": b3}


def reference_forward_prepared(x, prep, output_size):
    """Precision-matched reference (bf16 MXU inputs, f32 accumulation, padded)."""
    I_pad = prep["w1t"].shape[0]
    xp = jnp.pad(x, ((0, 0), (0, I_pad - x.shape[1])))
    xb = xp.astype(jnp.bfloat16)
    h1 = jnp.maximum(
        jnp.dot(xb, prep["w1t"], preferred_element_type=jnp.float32) + prep["b1"], 0.0)
    h2 = jnp.maximum(
        jnp.dot(h1.astype(jnp.bfloat16), prep["w2t"],
                preferred_element_type=jnp.float32) + prep["b2"], 0.0)
    logits = (jnp.dot(h2.astype(jnp.bfloat16), prep["w3t"],
                      preferred_element_type=jnp.float32) + prep["b3"])
    return jax.nn.softmax(logits, axis=1)[:, :output_size]


def reference_forward_f32(x, params):
    """Pure f32 reference matching the PyTorch module exactly."""
    h1 = jnp.maximum(x @ params["w1"].T + params["b1"], 0.0)
    h2 = jnp.maximum(h1 @ params["w2"].T + params["b2"], 0.0)
    logits = h2 @ params["w3"].T + params["b3"]
    return jax.nn.softmax(logits, axis=1)


if __name__ == "__main__":
    # Shapes consistent with the module's feature extractor:
    #   input = 2*81 pos one-hots + 72 + 72 walls + 2 wall counts + 1 player = 309.
    batch, input_size, hidden_size, output_size = 256, 309, 128, 140

    key = jax.random.PRNGKey(0)
    kx, kp = jax.random.split(key)
    x = jax.random.normal(kx, (batch, input_size), jnp.float32)
    params = init_params(kp, input_size, hidden_size, output_size)
    prep = prepare_params(params)  # one-time transpose + pad + bf16 cast

    out = neural_net_policy_forward(x, prep, output_size=output_size)
    out = jax.block_until_ready(out)

    assert out.shape == (batch, output_size)
    # Softmax rows sum to 1 (padded columns are exactly 0; exact reciprocal).
    assert jnp.allclose(jnp.sum(out, axis=1), 1.0, atol=1e-5)
    # Precision-matched reference (same bf16-weight / f32-accumulate path).
    ref_bf16 = reference_forward_prepared(x, prep, output_size)
    assert jnp.allclose(out, ref_bf16, atol=1e-4, rtol=1e-3)
    # Semantic check vs. the pure-f32 PyTorch-equivalent forward.
    ref_f32 = reference_forward_f32(x, params)
    assert jnp.allclose(out, ref_f32, atol=5e-3)

    print("KERNEL_OK")
</pallas_src>

<mosaic_0001>
module attributes {stable_mosaic.version = 11 : i64} {
  func.func @mlp_policy_kernel(%arg0: i32, %arg1: memref<256x384xf32, #tpu.memory_space<vmem>>, %arg2: memref<384x128xbf16, #tpu.memory_space<vmem>>, %arg3: memref<1x128xf32, #tpu.memory_space<vmem>>, %arg4: memref<128x128xbf16, #tpu.memory_space<vmem>>, %arg5: memref<1x128xf32, #tpu.memory_space<vmem>>, %arg6: memref<128x256xbf16, #tpu.memory_space<vmem>>, %arg7: memref<1x256xf32, #tpu.memory_space<vmem>>, %arg8: memref<256x256xf32, #tpu.memory_space<vmem>>) attributes {dimension_semantics = [#tpu.dimension_semantics<parallel>], iteration_bounds = array<i64: 1>, scalar_prefetch = 0 : i64, scratch_operands = 0 : i64, tpu.core_type = #tpu.core_type<tc>, window_params = [{transform_indices = @transform_0, window_bounds = array<i64: 256, 384>}, {pipeline_mode = #tpu.pipeline_mode<synchronous>, transform_indices = @transform_1, window_bounds = array<i64: 384, 128>}, {pipeline_mode = #tpu.pipeline_mode<synchronous>, transform_indices = @transform_2, window_bounds = array<i64: 1, 128>}, {pipeline_mode = #tpu.pipeline_mode<synchronous>, transform_indices = @transform_3, window_bounds = array<i64: 128, 128>}, {pipeline_mode = #tpu.pipeline_mode<synchronous>, transform_indices = @transform_4, window_bounds = array<i64: 1, 128>}, {pipeline_mode = #tpu.pipeline_mode<synchronous>, transform_indices = @transform_5, window_bounds = array<i64: 128, 256>}, {pipeline_mode = #tpu.pipeline_mode<synchronous>, transform_indices = @transform_6, window_bounds = array<i64: 1, 256>}, {transform_indices = @transform_7, window_bounds = array<i64: 256, 256>}]} {
    %c0 = arith.constant 0 : index
    %c0_0 = arith.constant 0 : index
    %0 = vector.load %arg1[%c0, %c0_0] : memref<256x384xf32, #tpu.memory_space<vmem>>, vector<256x384xf32>
    %1 = arith.truncf %0 : vector<256x384xf32> to vector<256x384xbf16>
    %c0_1 = arith.constant 0 : index
    %c0_2 = arith.constant 0 : index
    %2 = vector.load %arg2[%c0_1, %c0_2] : memref<384x128xbf16, #tpu.memory_space<vmem>>, vector<384x128xbf16>
    %cst = arith.constant dense<0.000000e+00> : vector<256x128xf32>
    %3 = tpu.matmul %1, %2, %cst {dimension_numbers = #tpu.dot_dimension_numbers<[1], [0], [0], [1], [0, 0, 1, 1], [], []>} : vector<256x384xbf16>, vector<384x128xbf16>, vector<256x128xf32> -> vector<256x128xf32>
    %c0_3 = arith.constant 0 : index
    %c0_4 = arith.constant 0 : index
    %4 = vector.load %arg3[%c0_3, %c0_4] : memref<1x128xf32, #tpu.memory_space<vmem>>, vector<1x128xf32>
    %5 = vector.broadcast %4 : vector<1x128xf32> to vector<256x128xf32>
    %6 = arith.addf %3, %5 : vector<256x128xf32>
    %cst_5 = arith.constant 0.000000e+00 : f32
    %7 = vector.broadcast %cst_5 : f32 to vector<256x128xf32>
    %8 = arith.maximumf %6, %7 : vector<256x128xf32>
    %9 = arith.truncf %8 : vector<256x128xf32> to vector<256x128xbf16>
    %c0_6 = arith.constant 0 : index
    %c0_7 = arith.constant 0 : index
    %10 = vector.load %arg4[%c0_6, %c0_7] : memref<128x128xbf16, #tpu.memory_space<vmem>>, vector<128x128xbf16>
    %cst_8 = arith.constant dense<0.000000e+00> : vector<256x128xf32>
    %11 = tpu.matmul %9, %10, %cst_8 {dimension_numbers = #tpu.dot_dimension_numbers<[1], [0], [0], [1], [0, 0, 1, 1], [], []>} : vector<256x128xbf16>, vector<128x128xbf16>, vector<256x128xf32> -> vector<256x128xf32>
    %c0_9 = arith.constant 0 : index
    %c0_10 = arith.constant 0 : index
    %12 = vector.load %arg5[%c0_9, %c0_10] : memref<1x128xf32, #tpu.memory_space<vmem>>, vector<1x128xf32>
    %13 = vector.broadcast %12 : vector<1x128xf32> to vector<256x128xf32>
    %14 = arith.addf %11, %13 : vector<256x128xf32>
    %cst_11 = arith.constant 0.000000e+00 : f32
    %15 = vector.broadcast %cst_11 : f32 to vector<256x128xf32>
    %16 = arith.maximumf %14, %15 : vector<256x128xf32>
    %17 = arith.truncf %16 : vector<256x128xf32> to vector<256x128xbf16>
    %c0_12 = arith.constant 0 : index
    %c0_13 = arith.constant 0 : index
    %18 = vector.load %arg6[%c0_12, %c0_13] : memref<128x256xbf16, #tpu.memory_space<vmem>>, vector<128x256xbf16>
    %cst_14 = arith.constant dense<0.000000e+00> : vector<256x256xf32>
    %19 = tpu.matmul %17, %18, %cst_14 {dimension_numbers = #tpu.dot_dimension_numbers<[1], [0], [0], [1], [0, 0, 1, 1], [], []>} : vector<256x128xbf16>, vector<128x256xbf16>, vector<256x256xf32> -> vector<256x256xf32>
    %c0_15 = arith.constant 0 : index
    %c0_16 = arith.constant 0 : index
    %20 = vector.load %arg7[%c0_15, %c0_16] : memref<1x256xf32, #tpu.memory_space<vmem>>, vector<1x256xf32>
    %21 = vector.broadcast %20 : vector<1x256xf32> to vector<256x256xf32>
    %22 = arith.addf %19, %21 : vector<256x256xf32>
    %cst_17 = arith.constant dense<0xFF800000> : vector<256xf32>
    %23 = vector.multi_reduction <maximumf>, %22, %cst_17 [1] : vector<256x256xf32> to vector<256xf32>
    %24 = vector.shape_cast %23 : vector<256xf32> to vector<256x1xf32>
    %25 = vector.broadcast %24 : vector<256x1xf32> to vector<256x256xf32>
    %26 = arith.subf %22, %25 : vector<256x256xf32>
    %27 = math.exp %26 : vector<256x256xf32>
    %cst_18 = arith.constant dense<0.000000e+00> : vector<256xf32>
    %28 = vector.multi_reduction <add>, %27, %cst_18 [1] : vector<256x256xf32> to vector<256xf32>
    %29 = vector.shape_cast %28 : vector<256xf32> to vector<256x1xf32>
    %30 = tpu.reciprocal %29 : vector<256x1xf32> -> vector<256x1xf32>
    %31 = vector.broadcast %30 : vector<256x1xf32> to vector<256x256xf32>
    %32 = arith.mulf %27, %31 : vector<256x256xf32>
    %c0_19 = arith.constant 0 : index
    %c0_20 = arith.constant 0 : index
    %33 = vector.load %arg8[%c0_19, %c0_20] : memref<256x256xf32, #tpu.memory_space<vmem>>, vector<256x256xf32>
    tpu.vector_store %arg8[%c0_19, %c0_20], %32 {strides = array<i32>} : memref<256x256xf32, #tpu.memory_space<vmem>>, vector<256x256xf32>,
    return
  }
  func.func @transform_0(%arg0: i32) -> (i32, i32) {
    %c0_i32 = arith.constant 0 : i32
    %c0_i32_0 = arith.constant 0 : i32
    return %arg0, %c0_i32 : i32, i32
  }
  func.func @transform_1(%arg0: i32) -> (i32, i32) {
    %c0_i32 = arith.constant 0 : i32
    %c0_i32_0 = arith.constant 0 : i32
    %c0_i32_1 = arith.constant 0 : i32
    return %c0_i32, %c0_i32_0 : i32, i32
  }
  func.func @transform_2(%arg0: i32) -> (i32, i32) {
    %c0_i32 = arith.constant 0 : i32
    %c0_i32_0 = arith.constant 0 : i32
    %c0_i32_1 = arith.constant 0 : i32
    return %c0_i32, %c0_i32_0 : i32, i32
  }
  func.func @transform_3(%arg0: i32) -> (i32, i32) {
    %c0_i32 = arith.constant 0 : i32
    %c0_i32_0 = arith.constant 0 : i32
    %c0_i32_1 = arith.constant 0 : i32
    return %c0_i32, %c0_i32_0 : i32, i32
  }
  func.func @transform_4(%arg0: i32) -> (i32, i32) {
    %c0_i32 = arith.constant 0 : i32
    %c0_i32_0 = arith.constant 0 : i32
    %c0_i32_1 = arith.constant 0 : i32
    return %c0_i32, %c0_i32_0 : i32, i32
  }
  func.func @transform_5(%arg0: i32) -> (i32, i32) {
    %c0_i32 = arith.constant 0 : i32
    %c0_i32_0 = arith.constant 0 : i32
    %c0_i32_1 = arith.constant 0 : i32
    return %c0_i32, %c0_i32_0 : i32, i32
  }
  func.func @transform_6(%arg0: i32) -> (i32, i32) {
    %c0_i32 = arith.constant 0 : i32
    %c0_i32_0 = arith.constant 0 : i32
    %c0_i32_1 = arith.constant 0 : i32
    return %c0_i32, %c0_i32_0 : i32, i32
  }
  func.func @transform_7(%arg0: i32) -> (i32, i32) {
    %c0_i32 = arith.constant 0 : i32
    %c0_i32_0 = arith.constant 0 : i32
    return %arg0, %c0_i32 : i32, i32
  }
}

</mosaic_0001>

<bundles_post_ra>
// kernel: tpu_custom_call.1
= control target key start
LH: loop header
LB: loop body
LE: loop exit
PB: predicated region body
PF: predicated region fallthrough
CT: control target
= control target key end

     0   :  { %12 = vsyncpa [#allocation3], 0  ;;  %s3491_s0 = inlined_call_operand.hbm [shape: f32[256,384], index: 0, kind: input, shape index: {}]   ;;  %s3492_s1 = inlined_call_operand.hbm [shape: bf16[384,128], index: 1, kind: input, shape index: {}]   ;;  %s3493_s2 = inlined_call_operand.vmem [shape: f32[1,128], index: 2, kind: input, shape index: {}]   ;;  %s3494_s3 = inlined_call_operand.hbm [shape: bf16[128,128], index: 3, kind: input, shape index: {}]   ;;  %s3495_s4 = inlined_call_operand.vmem [shape: f32[1,128], index: 4, kind: input, shape index: {}]   ;;  %s3496_s5 = inlined_call_operand.hbm [shape: bf16[128,256], index: 5, kind: input, shape index: {}]   ;;  %s3497_s6 = inlined_call_operand.vmem [shape: f32[1,256], index: 6, kind: input, shape index: {}]   ;;  %s3498_s7 = inlined_call_operand.hbm [shape: f32[256,256], index: 7, kind: output, shape index: {}]  }
   0x1   :  { %13 = vsyncpa [#allocation6], 0 }
   0x2   :  { %14 = vsyncpa [#allocation9], 0 }
   0x3   :  { %15 = vsyncpa [#allocation4], 0  ;;  %s2632_s24 = smov [#allocation5]  }
   0x4   :  { %s33_s25 = sshll.u32 %s2632_s24, 4  ;;  %s34_s25 = int_to_ptr.vmem [resolvable:$true] %s33_s25 }
   0x5   :  { %s2532_s26 = scalar_lea.vmem %s34_s25, 3072  ;;  %p2537_p1 = scmp.lt.s32.totalorder %s34_s25, %s34_s25 }
   0x6   :  { %p2533_p0 = scmp.ne.s32.totalorder %s34_s25, %s2532_s26  ;;  %p2538_p2 = scmp.lt.s32.totalorder %s2532_s26, %s2532_s26 }
   0x8   :  { %p2539_p3 = por %p2538_p2, %p2537_p1 }
   0xa   :  { %p2540_p4 = pnand %p2539_p3, %p2533_p0 }
   0xc   :  { %2543 = shalt.err (!%p2540_p4)
}
   0xd   :  { %s2633_s27 = smov 64   ;;  %s2634_s28 = smov 4  }
   0xe   :  { %39 = dma.hbm_to_vmem [thread:$0]  %s3492_s1, 3072, %s34_s25, [#allocation6], %s2633_s27, %s2633_s27, %s2634_s28  }
   0xf   :  { %s2635_s8 = smov [#allocation2]  }
  0x10   :  { %s21_s9 = sshll.u32 %s2635_s8, 4  ;;  %s22_s9 = int_to_ptr.vmem [resolvable:$true] %s21_s9 }
  0x11   :  { %s2552_s10 = scalar_lea.vmem %s22_s9, 12288  ;;  %p2557_p6 = scmp.lt.s32.totalorder %s22_s9, %s22_s9 }
  0x12   :  { %p2553_p5 = scmp.ne.s32.totalorder %s22_s9, %s2552_s10  ;;  %p2558_p7 = scmp.lt.s32.totalorder %s2552_s10, %s2552_s10 }
  0x14   :  { %p2559_p8 = por %p2558_p7, %p2557_p6 }
  0x16   :  { %p2560_p9 = pnand %p2559_p8, %p2553_p5 }
  0x18   :  { %2563 = shalt.err (!%p2560_p9)
}
  0x19   :  { %s2636_s11 = smov 384   ;;  %s2637_s12 = smov 24  }
  0x1a   :  { %27 = dma.hbm_to_vmem [thread:$0]  %s3491_s0, 12288, %s22_s9, [#allocation3], %s2636_s11, %s2636_s11, %s2637_s12  }
  0x1b   :  { %s2638_s15 = smov [#allocation7]   ;;  %s2639_s17 = smov [#allocation8]  }
  0x1c   :  { %s47_s16 = sshll.u32 %s2638_s15, 4  ;;  %s61_s1 = sshll.u32 %s2639_s17, 4  ;;  %s48_s16 = int_to_ptr.vmem [resolvable:$true] %s47_s16  ;;  %s62_s1 = int_to_ptr.vmem [resolvable:$true] %s61_s1 }
  0x1d   :  { %s2572_s18 = scalar_lea.vmem %s48_s16, 1024  ;;  %p2577_p11 = scmp.lt.s32.totalorder %s48_s16, %s48_s16 }
  0x1e   :  { %p2573_p10 = scmp.ne.s32.totalorder %s48_s16, %s2572_s18  ;;  %p2578_p12 = scmp.lt.s32.totalorder %s2572_s18, %s2572_s18 }
  0x20   :  { %p2579_p13 = por %p2578_p12, %p2577_p11 }
  0x22   :  { %p2580_p0 = pnand %p2579_p13, %p2573_p10 }
  0x24   :  { %2583 = shalt.err (!%p2580_p0)
}
  0x25   :  { %53 = dma.hbm_to_vmem [thread:$0]  %s3494_s3, 1024, %s48_s16, [#allocation6], %s2633_s27, %s2633_s27, %s2634_s28  }
  0x26   :  { %s2592_s0 = scalar_lea.vmem %s62_s1, 2048  ;;  %p2597_p2 = scmp.lt.s32.totalorder %s62_s1, %s62_s1 }
  0x27   :  { %p2593_p1 = scmp.ne.s32.totalorder %s62_s1, %s2592_s0  ;;  %p2598_p3 = scmp.lt.s32.totalorder %s2592_s0, %s2592_s0 }
  0x29   :  { %p2599_p4 = por %p2598_p3, %p2597_p2 }
  0x2b   :  { %p2600_p5 = pnand %p2599_p4, %p2593_p1 }
  0x2d   :  { %2603 = shalt.err (!%p2600_p5)
}
  0x2e   :  { %s2640_s21 = smov 128   ;;  %s2641_s22 = smov 8  }
  0x2f   :  { %67 = dma.hbm_to_vmem [thread:$0]  %s3496_s5, 2048, %s62_s1, [#allocation9], %s2640_s21, %s2640_s21, %s2641_s22  }
  0x30   :  { %2624 = dma.done.wait [#allocation3], 12288  }
  0x31   :  { %2625 = vsyncadd [#allocation3], 4294955008 }
  0x32   :  { %2626 = dma.done.wait [#allocation6], 4096  }
  0x33   :  { %2627 = vsyncadd [#allocation6], 4294963200 }
  0x34   :  { %2628 = dma.done.wait [#allocation9], 2048  }
  0x35   :  { %2629 = vsyncadd [#allocation9], 4294965248  ;;  %v2276_v0 = vld [vmem:[#allocation5 + $0x78] sm:$0xff]   ;;  %v2278_v2 = vld [vmem:[#allocation5 + $0x70] sm:$0xff]  }
  0x36   :  { %v2277_v1 = vld [vmem:[#allocation5 + $0x38] sm:$0xff]   ;;  %2246 = vmatprep.subr.bf16.mxu1 %v2276_v0  ;;  %1990 = vmatprep.subr.bf16.mxu0 %v2276_v0  ;;  %v2279_v3 = vld [vmem:[#allocation5 + $0x30] sm:$0xff]   ;;  %v2280_v4 = vld [vmem:[#allocation5 + $0x68] sm:$0xff]  }
  0x37   :  { %2254 = vmatpush3.bf16.msra.mxu1 %v2277_v1  ;;  %1991 = vmatpush3.bf16.msra.mxu0 %v2277_v1  ;;  %v2281_v5 = vld [vmem:[#allocation5 + $0x28] sm:$0xff]   ;;  %v2282_v6 = vld [vmem:[#allocation5 + $0x60] sm:$0xff]   ;;  %v2284_v8 = vld [vmem:[#allocation5 + $0x58] sm:$0xff]  }
  0x38   :  { %2247 = vmatprep.subr.bf16.mxu1 %v2278_v2  ;;  %1992 = vmatprep.subr.bf16.mxu0 %v2278_v2  ;;  %v2283_v7 = vld [vmem:[#allocation5 + $0x20] sm:$0xff]   ;;  %v2285_v9 = vld [vmem:[#allocation5 + $0x18] sm:$0xff]   ;;  %v2286_v10 = vld [vmem:[#allocation5 + $0x50] sm:$0xff]  }
  0x39   :  { %v132_v11 = vld [vmem:[#allocation2 + $0x188] sm:$0xff]  ;;  %v135_v12 = vld [vmem:[#allocation2 + $0x1a0] sm:$0xff]  ;;  %v2287_v14 = vld [vmem:[#allocation5 + $0x10] sm:$0xff]  }
  0x3a   :  { %v204_v13 = vpack.c.bf16 %v135_v12, %v132_v11  ;;  %v2288_v15 = vld [vmem:[#allocation5 + $0x48] sm:$0xff]   ;;  %v2290_v17 = vld [vmem:[#allocation5 + $0x40] sm:$0xff]   ;;  %v134_v23 = vld [vmem:[#allocation2 + $0x198] sm:$0xff] }
  0x3b   :  { %2255 = vmatpush3.bf16.msra.mxu1 %v2279_v3  ;;  %1993 = vmatpush3.bf16.msra.mxu0 %v2279_v3  ;;  %v2289_v16 = vld [vmem:[#allocation5 + $0x8] sm:$0xff]   ;;  %v87_v19 = vld [vmem:[#allocation2 + $0x20] sm:$0xff]  ;;  %v2292_v24 = vld [vmem:[#allocation5 + $0xb8] sm:$0xff]  }
  0x3c   :  { %2248 = vmatprep.subr.bf16.mxu1 %v2280_v4  ;;  %1994 = vmatprep.subr.bf16.mxu0 %v2280_v4  ;;  %v84_v18 = vld [vmem:[#allocation2 + $0x8] sm:$0xff]  ;;  %v2291_v20 = vld [vmem:[#allocation5] sm:$0xff]   ;;  %v138_v25 = vld [vmem:[#allocation2 + $0x1b8] sm:$0xff] }
  0x3d   :  { %522 = vmatprep.mubr.bf16.mxu1 %v204_v13  ;;  %v131_v21 = vld [vmem:[#allocation2 + $0x180] sm:$0xff]  ;;  %v180_v22 = vpack.c.bf16 %v87_v19, %v84_v18  ;;  %v141_v26 = vld [vmem:[#allocation2 + $0x1d0] sm:$0xff]  ;;  %v86_v28 = vld [vmem:[#allocation2 + $0x18] sm:$0xff] }
  0x3e   :  { %v83_v27 = vld [vmem:[#allocation2] sm:$0xff]  ;;  %v203_v29 = vpack.c.bf16 %v134_v23, %v131_v21  ;;  %v90_v30 = vld [vmem:[#allocation2 + $0x38] sm:$0xff]  ;;  %v93_v31 = vld [vmem:[#allocation2 + $0x50] sm:$0xff]  ;;  %v207_v32 = vpack.c.bf16 %v141_v26, %v138_v25 }
  0x3f   :  { %2256 = vmatpush3.bf16.msra.mxu1 %v2281_v5  ;;  %1995 = vmatpush3.bf16.msra.mxu0 %v2281_v5  ;;  %v2293_v33 = vld [vmem:[#allocation5 + $0xb0] sm:$0xff]   ;;  %v179_v34 = vpack.c.bf16 %v86_v28, %v83_v27  ;;  %v183_v35 = vpack.c.bf16 %v93_v31, %v90_v30  ;;  %v140_v37 = vld [vmem:[#allocation2 + $0x1c8] sm:$0xff]  ;;  %v147_v39 = vld [vmem:[#allocation2 + $0x200] sm:$0xff] }
  0x40   :  { %2249 = vmatprep.subr.bf16.mxu1 %v2282_v6  ;;  %1996 = vmatprep.subr.bf16.mxu0 %v2282_v6  ;;  %v137_v36 = vld [vmem:[#allocation2 + $0x1b0] sm:$0xff]  ;;  %v144_v38 = vld [vmem:[#allocation2 + $0x1e8] sm:$0xff]  ;;  %v99_v45 = vld [vmem:[#allocation2 + $0x80] sm:$0xff] }
  0x41   :  { %458 = vmatprep.mubr.bf16.mxu0 %v180_v22  ;;  %v2294_v40 = vld [vmem:[#allocation5 + $0xa8] sm:$0xff]   ;;  %v89_v41 = vld [vmem:[#allocation2 + $0x30] sm:$0xff]  ;;  %v206_v43 = vpack.c.bf16 %v140_v37, %v137_v36  ;;  %v210_v46 = vpack.c.bf16 %v147_v39, %v144_v38  ;;  %v2295_v47 = vld [vmem:[#allocation5 + $0xa0] sm:$0xff]  }
  0x42   :  { %v92_v42 = vld [vmem:[#allocation2 + $0x48] sm:$0xff]  ;;  %v143_v50 = vld [vmem:[#allocation2 + $0x1e0] sm:$0xff]  ;;  %v146_v51 = vld [vmem:[#allocation2 + $0x1f8] sm:$0xff] }
  0x43   :  { %2257 = vmatpush3.bf16.msra.mxu1 %v2283_v7  ;;  %1997 = vmatpush3.bf16.msra.mxu0 %v2283_v7  ;;  %v96_v44 = vld [vmem:[#allocation2 + $0x68] sm:$0xff]  ;;  %v182_v48 = vpack.c.bf16 %v92_v42, %v89_v41  ;;  %v150_v52 = vld [vmem:[#allocation2 + $0x218] sm:$0xff]  ;;  %v153_v53 = vld [vmem:[#allocation2 + $0x230] sm:$0xff]  ;;  %v209_v57 = vpack.c.bf16 %v146_v51, %v143_v50 }
  0x44   :  { %2250 = vmatprep.subr.bf16.mxu1 %v2284_v8  ;;  %1998 = vmatprep.subr.bf16.mxu0 %v2284_v8  ;;  %v186_v49 = vpack.c.bf16 %v99_v45, %v96_v44  ;;  %v2296_v54 = vld [vmem:[#allocation5 + $0x98] sm:$0xff]   ;;  %v95_v55 = vld [vmem:[#allocation2 + $0x60] sm:$0xff]  ;;  %v105_v59 = vld [vmem:[#allocation2 + $0xb0] sm:$0xff]  ;;  %v213_v60 = vpack.c.bf16 %v153_v53, %v150_v52 }
  0x45   :  { %v98_v56 = vld [vmem:[#allocation2 + $0x78] sm:$0xff]  ;;  %v2297_v61 = vld [vmem:[#allocation5 + $0x90] sm:$0xff]   ;;  %v152_v1 = vld [vmem:[#allocation2 + $0x228] sm:$0xff] }
  0x46   :  { %v102_v58 = vld [vmem:[#allocation2 + $0x98] sm:$0xff]  ;;  %v185_v62 = vpack.c.bf16 %v98_v56, %v95_v55  ;;  %v149_v0 = vld [vmem:[#allocation2 + $0x210] sm:$0xff]  ;;  %v156_v2 = vld [vmem:[#allocation2 + $0x248] sm:$0xff] }
  0x47   :  { %2258 = vmatpush3.bf16.msra.mxu1 %v2285_v9  ;;  %1999 = vmatpush3.bf16.msra.mxu0 %v2285_v9  ;;  %v189_v63 = vpack.c.bf16 %v105_v59, %v102_v58  ;;  %v159_v3 = vld [vmem:[#allocation2 + $0x260] sm:$0xff]  ;;  %v2298_v4 = vld [vmem:[#allocation5 + $0x88] sm:$0xff]   ;;  %v101_v5 = vld [vmem:[#allocation2 + $0x90] sm:$0xff]  ;;  %v212_v7 = vpack.c.bf16 %v152_v1, %v149_v0 }
  0x48   :  { %2251 = vmatprep.subr.bf16.mxu1 %v2286_v10  ;;  %2000 = vmatprep.subr.bf16.mxu0 %v2286_v10  ;;  %v104_v6 = vld [vmem:[#allocation2 + $0xa8] sm:$0xff]  ;;  %v111_v9 = vld [vmem:[#allocation2 + $0xe0] sm:$0xff]  ;;  %v216_v10 = vpack.c.bf16 %v159_v3, %v156_v2  ;;  %v110_v19 = vld [vmem:[#allocation2 + $0xd8] sm:$0xff] }
  0x49   :  { %v108_v8 = vld [vmem:[#allocation2 + $0xc8] sm:$0xff]  ;;  %v2299_v11 = vld [vmem:[#allocation5 + $0x80] sm:$0xff]   ;;  %v188_v12 = vpack.c.bf16 %v104_v6, %v101_v5  ;;  %v117_v21 = vld [vmem:[#allocation2 + $0x110] sm:$0xff] }
  0x4a   :  { %v155_v13 = vld [vmem:[#allocation2 + $0x240] sm:$0xff]  ;;  %v161_v26 = vld [vmem:[#allocation2 + $0x270] sm:$0xff]  ;;  %v164_v27 = vld [vmem:[#allocation2 + $0x288] sm:$0xff] }
  0x4b   :  { %2259 = vmatpush3.bf16.msra.mxu1 %v2287_v14  ;;  %2001 = vmatpush3.bf16.msra.mxu0 %v2287_v14  ;;  %v158_v14 = vld [vmem:[#allocation2 + $0x258] sm:$0xff]  ;;  %v107_v18 = vld [vmem:[#allocation2 + $0xc0] sm:$0xff]  ;;  %v168_v28 = vld [vmem:[#allocation2 + $0x2a8] sm:$0xff] }
  0x4c   :  { %2252 = vmatprep.subr.bf16.mxu1 %v2288_v15  ;;  %2002 = vmatprep.subr.bf16.mxu0 %v2288_v15  ;;  %v192_v15 = vpack.c.bf16 %v111_v9, %v108_v8  ;;  %v215_v22 = vpack.c.bf16 %v158_v14, %v155_v13  ;;  %v113_v30 = vld [vmem:[#allocation2 + $0xf0] sm:$0xff]  ;;  %v116_v31 = vld [vmem:[#allocation2 + $0x108] sm:$0xff]  ;;  %v167_v38 = vld [vmem:[#allocation2 + $0x2a0] sm:$0xff] }
  0x4d   :  { %v194_v36 = vpack.c.bf16 %v116_v31, %v113_v30  ;;  %v170_v39 = vld [vmem:[#allocation2 + $0x2b8] sm:$0xff]  ;;  %v177_v41 = vld [vmem:[#allocation2 + $0x2f0] sm:$0xff]  ;;  %v119_v42 = vld [vmem:[#allocation2 + $0x120] sm:$0xff] }
  0x4e   :  { %v221_v44 = vpack.c.bf16 %v170_v39, %v167_v38  ;;  %v126_v45 = vld [vmem:[#allocation2 + $0x158] sm:$0xff]  ;;  %v173_v50 = vld [vmem:[#allocation2 + $0x2d0] sm:$0xff]  ;;  %v176_v51 = vld [vmem:[#allocation2 + $0x2e8] sm:$0xff] }
  0x4f   :  { %2260 = vmatpush3.bf16.msra.mxu1 %v2289_v16  ;;  %2003 = vmatpush3.bf16.msra.mxu0 %v2289_v16  ;;  %v162_v16 = vld [vmem:[#allocation2 + $0x278] sm:$0xff]  ;;  %v85_v52 = vld [vmem:[#allocation2 + $0x10] sm:$0xff]  ;;  %v88_v53 = vld [vmem:[#allocation2 + $0x28] sm:$0xff]  ;;  %v224_v56 = vpack.c.bf16 %v176_v51, %v173_v50 }
  0x50   :  { %2253 = vmatprep.subr.bf16.mxu1 %v2290_v17  ;;  %2004 = vmatprep.subr.bf16.mxu0 %v2290_v17  ;;  %v165_v17 = vld [vmem:[#allocation2 + $0x290] sm:$0xff]  ;;  %v128_v55 = vld [vmem:[#allocation2 + $0x168] sm:$0xff]  ;;  %v91_v59 = vld [vmem:[#allocation2 + $0x40] sm:$0xff] }
  0x51   :  { %v219_v23 = vpack.c.bf16 %v165_v17, %v162_v16  ;;  %v103_v1 = vld [vmem:[#allocation2 + $0xa0] sm:$0xff]  ;;  %v106_v2 = vld [vmem:[#allocation2 + $0xb8] sm:$0xff]  ;;  %v109_v3 = vld [vmem:[#allocation2 + $0xd0] sm:$0xff] }
  0x52   :  { %v190_v5 = vpack.c.bf16 %v106_v2, %v103_v1  ;;  %v118_v8 = vld [vmem:[#allocation2 + $0x118] sm:$0xff]  ;;  %v121_v9 = vld [vmem:[#allocation2 + $0x130] sm:$0xff]  ;;  %v127_v14 = vld [vmem:[#allocation2 + $0x160] sm:$0xff] }
  0x53   :  { %2261 = vmatpush3.bf16.msra.mxu1 %v2291_v20  ;;  %2005 = vmatpush3.bf16.msra.mxu0 %v2291_v20  ;;  %v114_v20 = vld [vmem:[#allocation2 + $0xf8] sm:$0xff]  ;;  %v133_v16 = vld [vmem:[#allocation2 + $0x190] sm:$0xff]  ;;  %v136_v17 = vld [vmem:[#allocation2 + $0x1a8] sm:$0xff] }
  0x54   :  { %2150 = vmatprep.subr.bf16.mxu1 %v2292_v24  ;;  %v195_v25 = vpack.c.bf16 %v117_v21, %v114_v20  ;;  %v2300_v13 = vld [vmem:[#allocation7 + $0x38] sm:$0xff]   ;;  %v2301_v20 = vld [vmem:[#allocation7 + $0x30] sm:$0xff]   ;;  %v139_v21 = vld [vmem:[#allocation2 + $0x1c0] sm:$0xff] }
  0x55   :  { %v157_v30 = vld [vmem:[#allocation2 + $0x250] sm:$0xff]  ;;  %v160_v31 = vld [vmem:[#allocation2 + $0x268] sm:$0xff] }
  0x56   :  { %523 = vmatmul.mubr.bf16.vlgmr.msra.gmra.mxu1 %v203_v29  ;;  %459 = vmatmul.mubr.bf16.vlgmr.msra.gmra.mxu0 %v179_v34  ;;  %v171_v29 = vld [vmem:[#allocation2 + $0x2c0] sm:$0xff]  ;;  %v172_v38 = vld [vmem:[#allocation2 + $0x2c8] sm:$0xff]  ;;  %v2316_v1 = vld [vmem:[#allocation8 + $0x54] ss:$8 sps:$4 sm:$0xff]  }
  0x57   :  { %2151 = vmatpush3.bf16.msra.mxu1 %v2292_v24  ;;  %530 = vmatprep.mubr.bf16.mxu1 %v207_v32  ;;  %v191_v24 = vpack.c.bf16 %v110_v19, %v107_v18  ;;  %v218_v32 = vpack.c.bf16 %v164_v27, %v161_v26  ;;  %v123_v34 = vld [vmem:[#allocation2 + $0x140] sm:$0xff]  ;;  %v205_v19 = vpack.c.bf16 %v136_v17, %v133_v16  ;;  %v2302_v27 = vld [vmem:[#allocation7 + $0x28] sm:$0xff]  }
  0x58   :  { %2152 = vmatprep.subr.bf16.mxu1 %v2293_v33  ;;  %466 = vmatprep.mubr.bf16.mxu0 %v183_v35  ;;  %v222_v35 = vpack.c.bf16 %v171_v29, %v168_v28  ;;  %v151_v28 = vld [vmem:[#allocation2 + $0x220] sm:$0xff]  ;;  %v154_v29 = vld [vmem:[#allocation2 + $0x238] sm:$0xff] }
  0x5b   :  { %2153 = vmatpush3.bf16.msra.mxu1 %v2293_v33  ;;  %v120_v33 = vld [vmem:[#allocation2 + $0x128] sm:$0xff] }
  0x5c   :  { %2154 = vmatprep.subr.bf16.mxu1 %v2294_v40  ;;  %v198_v37 = vpack.c.bf16 %v123_v34, %v120_v33  ;;  %v217_v33 = vpack.c.bf16 %v160_v31, %v157_v30  ;;  %v2303_v34 = vld [vmem:[#allocation7 + $0x20] sm:$0xff]  }
  0x5e   :  { %531 = vmatmul.mubr.bf16.gmra.mxu1 %v206_v43  ;;  %467 = vmatmul.mubr.bf16.gmra.mxu0 %v182_v48  ;;  %v122_v43 = vld [vmem:[#allocation2 + $0x138] sm:$0xff] }
  0x5f   :  { %538 = vmatprep.mubr.bf16.mxu1 %v210_v46  ;;  %2155 = vmatpush3.bf16.msra.mxu1 %v2294_v40  ;;  %v174_v40 = vld [vmem:[#allocation2 + $0x2d8] sm:$0xff]  ;;  %v129_v46 = vld [vmem:[#allocation2 + $0x170] sm:$0xff]  ;;  %v197_v48 = vpack.c.bf16 %v122_v43, %v119_v42  ;;  %v175_v42 = vld [vmem:[#allocation2 + $0x2e0] sm:$0xff] }
  0x60   :  { %2156 = vmatprep.subr.bf16.mxu1 %v2295_v47  ;;  %474 = vmatprep.mubr.bf16.mxu0 %v186_v49  ;;  %v201_v49 = vpack.c.bf16 %v129_v46, %v126_v45  ;;  %v178_v43 = vld [vmem:[#allocation2 + $0x2f8] sm:$0xff]  ;;  %v2305_v45 = vld [vmem:[#allocation7 + $0x10] sm:$0xff]   ;;  %v2306_v46 = vld [vmem:[#allocation7 + $0x8] sm:$0xff]  }
  0x63   :  { %2157 = vmatpush3.bf16.msra.mxu1 %v2295_v47  ;;  %v225_v47 = vpack.c.bf16 %v177_v41, %v174_v40  ;;  %v2304_v41 = vld [vmem:[#allocation7 + $0x18] sm:$0xff]  }
  0x64   :  { %2158 = vmatprep.subr.bf16.mxu1 %v2296_v54 }
  0x66   :  { %539 = vmatmul.mubr.bf16.gmra.mxu1 %v209_v57  ;;  %475 = vmatmul.mubr.bf16.gmra.mxu0 %v185_v62  ;;  %v181_v57 = vpack.c.bf16 %v88_v53, %v85_v52  ;;  %v100_v62 = vld [vmem:[#allocation2 + $0x88] sm:$0xff] }
  0x67   :  { %546 = vmatprep.mubr.bf16.mxu1 %v213_v60  ;;  %2159 = vmatpush3.bf16.msra.mxu1 %v2296_v54  ;;  %v125_v54 = vld [vmem:[#allocation2 + $0x150] sm:$0xff]  ;;  %v94_v60 = vld [vmem:[#allocation2 + $0x58] sm:$0xff] }
  0x68   :  { %2160 = vmatprep.subr.bf16.mxu1 %v2297_v61  ;;  %482 = vmatprep.mubr.bf16.mxu0 %v189_v63  ;;  %v200_v58 = vpack.c.bf16 %v128_v55, %v125_v54  ;;  %v184_v63 = vpack.c.bf16 %v94_v60, %v91_v59  ;;  %v2313_v59 = vld [vmem:[#allocation8 + $0x64] ss:$8 sps:$4 sm:$0xff]  }
  0x6b   :  { %2161 = vmatpush3.bf16.msra.mxu1 %v2297_v61  ;;  %v97_v61 = vld [vmem:[#allocation2 + $0x70] sm:$0xff] }
  0x6c   :  { %2162 = vmatprep.subr.bf16.mxu1 %v2298_v4  ;;  %v187_v0 = vpack.c.bf16 %v100_v62, %v97_v61  ;;  %v2311_v62 = vld [vmem:[#allocation8 + $0x60] ss:$8 sps:$4 sm:$0xff]  }
  0x6e   :  { %547 = vmatmul.mubr.bf16.gmra.mxu1 %v212_v7  ;;  %483 = vmatmul.mubr.bf16.gmra.mxu0 %v188_v12  ;;  %v115_v7 = vld [vmem:[#allocation2 + $0x100] sm:$0xff] }
  0x6f   :  { %554 = vmatprep.mubr.bf16.mxu1 %v216_v10  ;;  %2163 = vmatpush3.bf16.msra.mxu1 %v2298_v4  ;;  %v112_v4 = vld [vmem:[#allocation2 + $0xe8] sm:$0xff] }
  0x70   :  { %2164 = vmatprep.subr.bf16.mxu1 %v2299_v11  ;;  %490 = vmatprep.mubr.bf16.mxu0 %v192_v15  ;;  %v193_v6 = vpack.c.bf16 %v112_v4, %v109_v3  ;;  %v124_v10 = vld [vmem:[#allocation2 + $0x148] sm:$0xff]  ;;  %v130_v15 = vld [vmem:[#allocation2 + $0x178] sm:$0xff] }
  0x71   :  { %v199_v12 = vpack.c.bf16 %v124_v10, %v121_v9  ;;  %v202_v18 = vpack.c.bf16 %v130_v15, %v127_v14  ;;  %v2322_v15 = vld [vmem:[#allocation8 + $0x34] ss:$8 sps:$4 sm:$0xff]  }
  0x73   :  { %2165 = vmatpush3.bf16.msra.mxu1 %v2299_v11  ;;  %v196_v11 = vpack.c.bf16 %v118_v8, %v115_v7  ;;  %v2319_v8 = vld [vmem:[#allocation8 + $0x44] ss:$8 sps:$4 sm:$0xff]  }
  0x74   :  { %2198 = vmatprep.subr.bf16.mxu1 %v2300_v13 }
  0x76   :  { %555 = vmatmul.mubr.bf16.gmra.mxu1 %v215_v22  ;;  %491 = vmatmul.mubr.bf16.gmra.mxu0 %v191_v24  ;;  %v142_v22 = vld [vmem:[#allocation2 + $0x1d8] sm:$0xff]  ;;  %v148_v24 = vld [vmem:[#allocation2 + $0x208] sm:$0xff] }
  0x77   :  { %562 = vmatprep.mubr.bf16.mxu1 %v219_v23  ;;  %498 = vmatprep.mubr.bf16.mxu0 %v195_v25  ;;  %v145_v23 = vld [vmem:[#allocation2 + $0x1f0] sm:$0xff]  ;;  %v208_v25 = vpack.c.bf16 %v142_v22, %v139_v21  ;;  %v2325_v22 = vld [vmem:[#allocation8 + $0x24] ss:$8 sps:$4 sm:$0xff]  }
  0x78   :  { %v211_v26 = vpack.c.bf16 %v148_v24, %v145_v23 }
  0x7e   :  { %563 = vmatmul.mubr.bf16.gmra.mxu1 %v218_v32  ;;  %499 = vmatmul.mubr.bf16.gmra.mxu0 %v194_v36  ;;  %v214_v32 = vpack.c.bf16 %v154_v29, %v151_v28  ;;  %v166_v36 = vld [vmem:[#allocation2 + $0x298] sm:$0xff] }
  0x7f   :  { %570 = vmatprep.mubr.bf16.mxu1 %v222_v35  ;;  %506 = vmatprep.mubr.bf16.mxu0 %v198_v37  ;;  %v163_v35 = vld [vmem:[#allocation2 + $0x280] sm:$0xff]  ;;  %v169_v37 = vld [vmem:[#allocation2 + $0x2b0] sm:$0xff] }
  0x80   :  { %v220_v39 = vpack.c.bf16 %v166_v36, %v163_v35  ;;  %v223_v40 = vpack.c.bf16 %v172_v38, %v169_v37  ;;  %v2328_v29 = vld [vmem:[#allocation8 + $0x14] ss:$8 sps:$4 sm:$0xff]  }
  0x86   :  { %571 = vmatmul.mubr.bf16.gmra.mxu1 %v221_v44  ;;  %507 = vmatmul.mubr.bf16.gmra.mxu0 %v197_v48  ;;  %v226_v44 = vpack.c.bf16 %v178_v43, %v175_v42 }
  0x87   :  { %578 = vmatprep.mubr.bf16.mxu1 %v225_v47  ;;  %514 = vmatprep.mubr.bf16.mxu0 %v201_v49  ;;  %v2307_v47 = vld [vmem:[#allocation7] sm:$0xff]  }
  0x8e   :  { %579 = vmatmul.mubr.bf16.gmra.mxu1 %v224_v56  ;;  %515 = vmatmul.mubr.bf16.gmra.mxu0 %v200_v58  ;;  %v2308_v56 = vld [vmem:[#allocation8 + $0x70] ss:$8 sps:$4 sm:$0xff]  }
  0x8f   :  { %2166 = vmatprep.mubr.bf16.mxu1 %v181_v57  ;;  %v2310_v57 = vld [vmem:[#allocation8 + $0x74] ss:$8 sps:$4 sm:$0xff]  }
  0x90   :  { %1184 = vmatprep.subr.bf16.mxu0 %v2310_v57 }
  0x91   :  { %1185 = vmatpush1.bf16.msra.mxu0 %v2308_v56 }
  0x92   :  { %1186 = vmatprep.subr.bf16.mxu0 %v2313_v59 }
  0x95   :  { %1187 = vmatpush1.bf16.msra.mxu0 %v2311_v62 }
  0x96   :  { %2167 = vmatmul.mubr.bf16.vlgmr.msra.gmra.mxu1 %v184_v63  ;;  %1188 = vmatprep.subr.bf16.mxu0 %v2316_v1 }
  0x97   :  { %2170 = vmatprep.mubr.bf16.mxu1 %v187_v0  ;;  %2199 = vmatpush3.bf16.msra.mxu1 %v2300_v13 }
  0x98   :  { %2200 = vmatprep.subr.bf16.mxu1 %v2301_v20 }
  0x9b   :  { %2201 = vmatpush3.bf16.msra.mxu1 %v2301_v20 }
  0x9c   :  { %2202 = vmatprep.subr.bf16.mxu1 %v2302_v27 }
  0x9e   :  { %2171 = vmatmul.mubr.bf16.gmra.mxu1 %v190_v5  ;;  %v2314_v5 = vld [vmem:[#allocation8 + $0x50] ss:$8 sps:$4 sm:$0xff]  }
  0x9f   :  { %2174 = vmatprep.mubr.bf16.mxu1 %v193_v6  ;;  %2203 = vmatpush3.bf16.msra.mxu1 %v2302_v27 }
  0xa0   :  { %2204 = vmatprep.subr.bf16.mxu1 %v2303_v34  ;;  %1189 = vmatpush1.bf16.msra.mxu0 %v2314_v5 }
  0xa1   :  { %1190 = vmatprep.subr.bf16.mxu0 %v2319_v8 }
  0xa3   :  { %2205 = vmatpush3.bf16.msra.mxu1 %v2303_v34 }
  0xa4   :  { %2206 = vmatprep.subr.bf16.mxu1 %v2304_v41 }
  0xa6   :  { %2175 = vmatmul.mubr.bf16.gmra.mxu1 %v196_v11 }
  0xa7   :  { %2178 = vmatprep.mubr.bf16.mxu1 %v199_v12  ;;  %2207 = vmatpush3.bf16.msra.mxu1 %v2304_v41  ;;  %v2317_v12 = vld [vmem:[#allocation8 + $0x40] ss:$8 sps:$4 sm:$0xff]  }
  0xa8   :  { %2208 = vmatprep.subr.bf16.mxu1 %v2305_v45  ;;  %1191 = vmatpush1.bf16.msra.mxu0 %v2317_v12 }
  0xa9   :  { %1192 = vmatprep.subr.bf16.mxu0 %v2322_v15 }
  0xab   :  { %2209 = vmatpush3.bf16.msra.mxu1 %v2305_v45 }
  0xac   :  { %2210 = vmatprep.subr.bf16.mxu1 %v2306_v46 }
  0xae   :  { %2179 = vmatmul.mubr.bf16.gmra.mxu1 %v202_v18 }
  0xaf   :  { %2182 = vmatprep.mubr.bf16.mxu1 %v205_v19  ;;  %2211 = vmatpush3.bf16.msra.mxu1 %v2306_v46  ;;  %v2320_v19 = vld [vmem:[#allocation8 + $0x30] ss:$8 sps:$4 sm:$0xff]  }
  0xb0   :  { %2212 = vmatprep.subr.bf16.mxu1 %v2307_v47  ;;  %1193 = vmatpush1.bf16.msra.mxu0 %v2320_v19 }
  0xb1   :  { %1194 = vmatprep.subr.bf16.mxu0 %v2325_v22 }
  0xb3   :  { %2213 = vmatpush3.bf16.msra.mxu1 %v2307_v47 }
  0xb6   :  { %2183 = vmatmul.mubr.bf16.gmra.mxu1 %v208_v25 }
  0xb7   :  { %2186 = vmatprep.mubr.bf16.mxu1 %v211_v26  ;;  %v2323_v26 = vld [vmem:[#allocation8 + $0x20] ss:$8 sps:$4 sm:$0xff]  }
  0xb8   :  { %1195 = vmatpush1.bf16.msra.mxu0 %v2323_v26 }
  0xb9   :  { %1196 = vmatprep.subr.bf16.mxu0 %v2328_v29 }
  0xbe   :  { %2187 = vmatmul.mubr.bf16.gmra.mxu1 %v214_v32 }
  0xbf   :  { %2190 = vmatprep.mubr.bf16.mxu1 %v217_v33  ;;  %v2326_v33 = vld [vmem:[#allocation8 + $0x10] ss:$8 sps:$4 sm:$0xff]  }
  0xc0   :  { %1197 = vmatpush1.bf16.msra.mxu0 %v2326_v33 }
  0xc6   :  { %2191 = vmatmul.mubr.bf16.gmra.mxu1 %v220_v39 }
  0xc7   :  { %2194 = vmatprep.mubr.bf16.mxu1 %v223_v40 }
  0xce   :  { %2195 = vmatmul.mubr.bf16.gmra.mxu1 %v226_v44 }
 0x116   :  { %v2054_v48 = vpop.f32.mrf.mxu1  ;;  %v2704_v50 = vpop.f32.mrf.mxu0 }
 0x118   :  { %v2055_v49 = vpop.f32.mrf.mxu1  ;;  %v2708_v53 = vpop.f32.mrf.mxu0 }
 0x119   :  { %v2706_v51 = vadd.f32 %v2055_v49, %v2054_v48 }
 0x11a   :  { %v2057_v52 = vpop.f32.mrf.mxu1  ;;  %v2710_v55 = vpop.f32.mrf.mxu0 }
 0x11c   :  { %v2058_v54 = vpop.f32.mrf.mxu1  ;;  %v2714_v61 = vpop.f32.mrf.mxu0 }
 0x11d   :  { %v2712_v58 = vadd.f32 %v2058_v54, %v2057_v52  ;;  %v2011_v33 = vadd.f32 %v2714_v61, %v2710_v55 }
 0x11e   :  { %v2060_v60 = vpop.f32.mrf.mxu1  ;;  %v2716_v0 = vpop.f32.mrf.mxu0 }
 0x120   :  { %v2061_v63 = vpop.f32.mrf.mxu1  ;;  %v2720_v4 = vpop.f32.mrf.mxu0 }
 0x121   :  { %v2718_v2 = vadd.f32 %v2061_v63, %v2060_v60  ;;  %v2014_v22 = vadd.f32 %v2720_v4, %v2716_v0 }
 0x122   :  { %v2063_v3 = vpop.f32.mrf.mxu1  ;;  %v2722_v7 = vpop.f32.mrf.mxu0 }
 0x124   :  { %v2064_v6 = vpop.f32.mrf.mxu1  ;;  %v2726_v11 = vpop.f32.mrf.mxu0 }
 0x125   :  { %v2724_v9 = vadd.f32 %v2064_v6, %v2063_v3  ;;  %v2017_v29 = vadd.f32 %v2726_v11, %v2722_v7 }
 0x126   :  { %v2066_v10 = vpop.f32.mrf.mxu1  ;;  %v2728_v14 = vpop.f32.mrf.mxu0 }
 0x128   :  { %v2067_v13 = vpop.f32.mrf.mxu1  ;;  %v2732_v18 = vpop.f32.mrf.mxu0 }
 0x129   :  { %v2730_v16 = vadd.f32 %v2067_v13, %v2066_v10  ;;  %v2020_v7 = vadd.f32 %v2732_v18, %v2728_v14 }
 0x12a   :  { %v2069_v17 = vpop.f32.mrf.mxu1  ;;  %v2734_v21 = vpop.f32.mrf.mxu0 }
 0x12c   :  { %v2070_v20 = vpop.f32.mrf.mxu1  ;;  %v2738_v25 = vpop.f32.mrf.mxu0 }
 0x12d   :  { %v2736_v23 = vadd.f32 %v2070_v20, %v2069_v17 }
 0x12e   :  { %v2072_v24 = vpop.f32.mrf.mxu1  ;;  %v2024_v28 = vpop.f32.mrf.mxu0 }
 0x130   :  { %v2073_v27 = vpop.f32.mrf.mxu1  ;;  %v2025_v32 = vpop.f32.mrf.mxu0 }
 0x131   :  { %v2740_v30 = vadd.f32 %v2073_v27, %v2072_v24  ;;  %v2008_v27 = vadd.f32 %v2708_v53, %v2704_v50  ;;  %v2026_v0 = vadd.f32 %v2025_v32, %v2024_v28 }
 0x132   :  { %v2075_v31 = vpop.f32.mrf.mxu1  ;;  %v2027_v35 = vpop.f32.mrf.mxu0 }
 0x134   :  { %v2076_v34 = vpop.f32.mrf.mxu1  ;;  %v2028_v38 = vpop.f32.mrf.mxu0 }
 0x135   :  { %v2742_v36 = vadd.f32 %v2076_v34, %v2075_v31  ;;  %v2787_v34 = vld [vmem:[%s3493_s2] ss:$0 sm:$0xff]  ;;  %v2029_v55 = vadd.f32 %v2028_v38, %v2027_v35 }
 0x136   :  { %v2078_v37 = vpop.f32.mrf.mxu1  ;;  %v2744_v40 = vpop.f32.mrf.mxu0  ;;  %v469_v4 = vadd.f32 %v2014_v22, %v2787_v34  ;;  %v461_v50 = vadd.f32 %v2008_v27, %v2787_v34  ;;  %v472_v53 = vadd.f32 %v2017_v29, %v2787_v34  ;;  %v485_v32 = vadd.f32 %v2026_v0, %v2787_v34 }
 0x137   :  { %v488_v35 = vadd.f32 %v2029_v55, %v2787_v34 }
 0x138   :  { %v2079_v39 = vpop.f32.mrf.mxu1  ;;  %v2748_v43 = vpop.f32.mrf.mxu0 }
 0x139   :  { %v2746_v41 = vadd.f32 %v2079_v39, %v2078_v37  ;;  %v2032_v27 = vadd.f32 %v2748_v43, %v2744_v40 }
 0x13a   :  { %v2081_v42 = vpop.f32.mrf.mxu1  ;;  %v2750_v45 = vpop.f32.mrf.mxu0 }
 0x13b   :  { %v493_v43 = vadd.f32 %v2032_v27, %v2787_v34 }
 0x13c   :  { %v2082_v44 = vpop.f32.mrf.mxu1  ;;  %v2754_v48 = vpop.f32.mrf.mxu0 }
 0x13d   :  { %v2752_v46 = vadd.f32 %v2082_v44, %v2081_v42  ;;  %v464_v44 = vadd.f32 %v2011_v33, %v2787_v34 }
 0x13e   :  { %v2084_v47 = vpop.f32.mrf.mxu1  ;;  %v2036_v52 = vpop.f32.mrf.mxu0 }
 0x140   :  { %v2085_v49 = vpop.f32.mrf.mxu1  ;;  %v2037_v57 = vpop.f32.mrf.mxu0 }
 0x141   :  { %v2756_v54 = vadd.f32 %v2085_v49, %v2084_v47 }
 0x142   :  { %v2087_v56 = vpop.f32.mrf.mxu1  ;;  %v2039_v60 = vpop.f32.mrf.mxu0 }
 0x144   :  { %v2088_v59 = vpop.f32.mrf.mxu1  ;;  %v2040_v3 = vpop.f32.mrf.mxu0 }
 0x145   :  { %v2758_v62 = vadd.f32 %v2088_v59, %v2087_v56 }
 0x146   :  { %v2090_v63 = vpop.f32.mrf.mxu1  ;;  %v2762_v10 = vpop.f32.mrf.mxu0 }
 0x148   :  { %v2091_v1 = vpop.f32.mrf.mxu1  ;;  %v2766_v17 = vpop.f32.mrf.mxu0 }
 0x149   :  { %v2760_v5 = vadd.f32 %v2091_v1, %v2090_v63  ;;  %v477_v1 = vadd.f32 %v2020_v7, %v2787_v34 }
 0x14a   :  { %v2093_v6 = vpop.f32.mrf.mxu1  ;;  %v2776_v26 = vpop.f32.mrf.mxu0 }
 0x14c   :  { %v2094_v8 = vpop.f32.mrf.mxu1  ;;  %v2790_v39 = vpop.f32.mrf.mxu0 }
 0x14d   :  { %v2764_v12 = vadd.f32 %v2094_v8, %v2093_v6  ;;  %v2023_v6 = vadd.f32 %v2738_v25, %v2734_v21  ;;  %v2038_v8 = vadd.f32 %v2037_v57, %v2036_v52 }
 0x14e   :  { %v2096_v13 = vpop.f32.mrf.mxu1  ;;  %v2048_v49 = vpop.f32.mrf.mxu0 }
 0x14f   :  { %v480_v21 = vadd.f32 %v2023_v6, %v2787_v34  ;;  %v501_v52 = vadd.f32 %v2038_v8, %v2787_v34 }
 0x150   :  { %v2097_v15 = vpop.f32.mrf.mxu1  ;;  %v2049_v22 = vpop.f32.mrf.mxu0 }
 0x151   :  { %v2768_v19 = vadd.f32 %v2097_v15, %v2096_v13 }
 0x152   :  { %v2770_v20 = vpop.f32.mrf.mxu1  ;;  %v2051_v57 = vpop.f32.mrf.mxu0 }
 0x154   :  { %v2774_v24 = vpop.f32.mrf.mxu1 }
 0x156   :  { %v2168_v31 = vpop.f32.mrf.mxu1 }
 0x157   :  { %v630_v47 = vadd.f32 %v2168_v31, %v469_v4  ;;  %v2041_v4 = vadd.f32 %v2040_v3, %v2039_v60 }
 0x158   :  { %v621_v37 = vpop.f32.mrf.mxu1 }
 0x159   :  { %v622_v61 = vadd.f32 %v621_v37, %v461_v50  ;;  %v750_v38 = vmax.f32 %v630_v47, 0.0  ;;  %v504_v3 = vadd.f32 %v2041_v4, %v2787_v34 }
 0x15a   :  { %v2169_v11 = vpop.f32.mrf.mxu1 }
 0x15b   :  { %v633_v42 = vadd.f32 %v2169_v11, %v472_v53  ;;  %v748_v14 = vmax.f32 %v622_v61, 0.0  ;;  %v2035_v53 = vadd.f32 %v2754_v48, %v2750_v45 }
 0x15c   :  { %v624_v28 = vpop.f32.mrf.mxu1 }
 0x15d   :  { %v625_v56 = vadd.f32 %v624_v28, %v464_v44  ;;  %v751_v59 = vmax.f32 %v633_v42, 0.0  ;;  %v2044_v42 = vadd.f32 %v2766_v17, %v2762_v10  ;;  %v2050_v28 = vadd.f32 %v2049_v22, %v2048_v49 }
 0x15e   :  { %v2172_v63 = vpop.f32.mrf.mxu1  ;;  %v496_v45 = vadd.f32 %v2035_v53, %v2787_v34  ;;  %v2047_v17 = vadd.f32 %v2790_v39, %v2776_v26  ;;  %v533_v53 = vadd.f32 %v2718_v2, %v2787_v34 }
 0x15f   :  { %v749_v18 = vmax.f32 %v625_v56, 0.0  ;;  %v646_v13 = vadd.f32 %v2172_v63, %v485_v32  ;;  %v781_v31 = vpack.c.bf16 %v751_v59, %v750_v38  ;;  %v2052_v32 = vpop.f32.mrf.mxu0 }
 0x160   :  { %v637_v15 = vpop.f32.mrf.mxu1 }
 0x161   :  { %v780_v29 = vpack.c.bf16 %v749_v18, %v748_v14  ;;  %v638_v0 = vadd.f32 %v637_v15, %v477_v1  ;;  %v754_v25 = vmax.f32 %v646_v13, 0.0  ;;  %v2053_v1 = vadd.f32 %v2052_v32, %v2051_v57 }
 0x162   :  { %v2173_v33 = vpop.f32.mrf.mxu1  ;;  %v517_v18 = vadd.f32 %v2050_v28, %v2787_v34 }
 0x163   :  { %v649_v37 = vadd.f32 %v2173_v33, %v488_v35  ;;  %2214 = vmatprep.mubr.bf16.mxu1 %v780_v29  ;;  %v752_v55 = vmax.f32 %v638_v0, 0.0  ;;  %v509_v35 = vadd.f32 %v2044_v42, %v2787_v34  ;;  %v520_v15 = vadd.f32 %v2053_v1, %v2787_v34 }
 0x164   :  { %v640_v50 = vpop.f32.mrf.mxu1  ;;  %2215 = vmatmul.mubr.bf16.vlgmr.msra.gmra.mxu1 %v781_v31  ;;  %v512_v0 = vadd.f32 %v2047_v17, %v2787_v34 }
 0x165   :  { %v755_v7 = vmax.f32 %v649_v37, 0.0  ;;  %v641_v40 = vadd.f32 %v640_v50, %v480_v21 }
 0x166   :  { %v2176_v11 = vpop.f32.mrf.mxu1 }
 0x167   :  { %v753_v60 = vmax.f32 %v641_v40, 0.0  ;;  %v783_v61 = vpack.c.bf16 %v755_v7, %v754_v25  ;;  %v662_v44 = vadd.f32 %v2176_v11, %v501_v52 }
 0x168   :  { %v653_v47 = vpop.f32.mrf.mxu1 }
 0x169   :  { %v782_v56 = vpack.c.bf16 %v753_v60, %v752_v55  ;;  %v654_v59 = vadd.f32 %v653_v47, %v493_v43  ;;  %v758_v6 = vmax.f32 %v662_v44, 0.0  ;;  %v525_v55 = vadd.f32 %v2706_v51, %v2787_v34 }
 0x16a   :  { %v2177_v48 = vpop.f32.mrf.mxu1  ;;  %v536_v60 = vadd.f32 %v2724_v9, %v2787_v34  ;;  %v528_v44 = vadd.f32 %v2712_v58, %v2787_v34  ;;  %v549_v51 = vadd.f32 %v2740_v30, %v2787_v34  ;;  %v552_v58 = vadd.f32 %v2742_v36, %v2787_v34 }
 0x16b   :  { %v665_v63 = vadd.f32 %v2177_v48, %v504_v3  ;;  %2218 = vmatprep.mubr.bf16.mxu1 %v782_v56  ;;  %v756_v10 = vmax.f32 %v654_v59, 0.0 }
 0x16c   :  { %v656_v14 = vpop.f32.mrf.mxu1  ;;  %2219 = vmatmul.mubr.bf16.gmra.mxu1 %v783_v61 }
 0x16d   :  { %v759_v49 = vmax.f32 %v665_v63, 0.0  ;;  %v657_v38 = vadd.f32 %v656_v14, %v496_v45 }
 0x16e   :  { %v2180_v8 = vpop.f32.mrf.mxu1 }
 0x16f   :  { %v757_v13 = vmax.f32 %v657_v38, 0.0  ;;  %v785_v22 = vpack.c.bf16 %v759_v49, %v758_v6  ;;  %v678_v27 = vadd.f32 %v2180_v8, %v517_v18  ;;  %v541_v6 = vadd.f32 %v2730_v16, %v2787_v34 }
 0x170   :  { %v669_v29 = vpop.f32.mrf.mxu1  ;;  %v565_v16 = vadd.f32 %v2756_v54, %v2787_v34  ;;  %v2101_v54 = vadd.f32 %v2774_v24, %v2770_v20  ;;  %v576_v24 = vadd.f32 %v2764_v12, %v2787_v34 }
 0x171   :  { %v784_v31 = vpack.c.bf16 %v757_v13, %v756_v10  ;;  %v670_v33 = vadd.f32 %v669_v29, %v509_v35  ;;  %v762_v21 = vmax.f32 %v678_v27, 0.0  ;;  %v544_v10 = vadd.f32 %v2736_v23, %v2787_v34 }
 0x172   :  { %v2181_v4 = vpop.f32.mrf.mxu1  ;;  %v568_v23 = vadd.f32 %v2758_v62, %v2787_v34 }
 0x173   :  { %v681_v37 = vadd.f32 %v2181_v4, %v520_v15  ;;  %2222 = vmatprep.mubr.bf16.mxu1 %v784_v31  ;;  %v760_v26 = vmax.f32 %v670_v33, 0.0  ;;  %v557_v31 = vadd.f32 %v2746_v41, %v2787_v34 }
 0x174   :  { %v672_v25 = vpop.f32.mrf.mxu1  ;;  %2223 = vmatmul.mubr.bf16.gmra.mxu1 %v785_v22 }
 0x175   :  { %v763_v39 = vmax.f32 %v681_v37, 0.0  ;;  %v673_v50 = vadd.f32 %v672_v25, %v512_v0  ;;  %v560_v37 = vadd.f32 %v2752_v46, %v2787_v34  ;;  %v581_v46 = vadd.f32 %v2768_v19, %v2787_v34  ;;  %v2331_v19 = vld [vmem:[#allocation8 + $0x4] ss:$8 sps:$4 sm:$0xff]  }
 0x176   :  { %v2184_v52 = vpop.f32.mrf.mxu1  ;;  %1198 = vmatprep.subr.bf16.mxu0 %v2331_v19 }
 0x177   :  { %v761_v57 = vmax.f32 %v673_v50, 0.0  ;;  %v787_v7 = vpack.c.bf16 %v763_v39, %v762_v21  ;;  %v694_v11 = vadd.f32 %v2184_v52, %v533_v53 }
 0x178   :  { %v685_v40 = vpop.f32.mrf.mxu1 }
 0x179   :  { %v786_v43 = vpack.c.bf16 %v761_v57, %v760_v26  ;;  %v686_v61 = vadd.f32 %v685_v40, %v525_v55  ;;  %v766_v2 = vmax.f32 %v694_v11, 0.0  ;;  %v584_v40 = vadd.f32 %v2101_v54, %v2787_v34 }
 0x17a   :  { %v2185_v3 = vpop.f32.mrf.mxu1 }
 0x17b   :  { %v697_v42 = vadd.f32 %v2185_v3, %v536_v60  ;;  %2226 = vmatprep.mubr.bf16.mxu1 %v786_v43  ;;  %v764_v59 = vmax.f32 %v686_v61, 0.0 }
 0x17c   :  { %v688_v47 = vpop.f32.mrf.mxu1  ;;  %2227 = vmatmul.mubr.bf16.gmra.mxu1 %v787_v7  ;;  %v573_v7 = vadd.f32 %v2760_v5, %v2787_v34 }
 0x17d   :  { %v767_v28 = vmax.f32 %v697_v42, 0.0  ;;  %v689_v32 = vadd.f32 %v688_v47, %v528_v44 }
 0x17e   :  { %v2188_v56 = vpop.f32.mrf.mxu1 }
 0x17f   :  { %v789_v45 = vpack.c.bf16 %v767_v28, %v766_v2  ;;  %v765_v48 = vmax.f32 %v689_v32, 0.0  ;;  %v710_v1 = vadd.f32 %v2188_v56, %v549_v51  ;;  %v2329_v28 = vld [vmem:[#allocation8] ss:$8 sps:$4 sm:$0xff]   ;;  %v2642_v32 = vmov 0  }
 0x180   :  { %v701_v9 = vpop.f32.mrf.mxu1  ;;  %1199 = vmatpush1.bf16.msra.mxu0 %v2329_v28  ;;  %1216 = vmatprep.mubr.bf16.mxu0 %v2642_v32  ;;  %v2856_v56 = vld [vmem:[%s3495_s4] ss:$0 sm:$0xff] }
 0x181   :  { %v788_v63 = vpack.c.bf16 %v765_v48, %v764_v59  ;;  %v702_v18 = vadd.f32 %v701_v9, %v541_v6  ;;  %v770_v49 = vmax.f32 %v710_v1, 0.0 }
 0x182   :  { %v2189_v14 = vpop.f32.mrf.mxu1 }
 0x183   :  { %v713_v35 = vadd.f32 %v2189_v14, %v552_v58  ;;  %2230 = vmatprep.mubr.bf16.mxu1 %v788_v63  ;;  %v768_v13 = vmax.f32 %v702_v18, 0.0 }
 0x184   :  { %v704_v17 = vpop.f32.mrf.mxu1  ;;  %2231 = vmatmul.mubr.bf16.gmra.mxu1 %v789_v45 }
 0x185   :  { %v771_v30 = vmax.f32 %v713_v35, 0.0  ;;  %v705_v38 = vadd.f32 %v704_v17, %v544_v10 }
 0x186   :  { %v2192_v8 = vpop.f32.mrf.mxu1 }
 0x187   :  { %v791_v15 = vpack.c.bf16 %v771_v30, %v770_v49  ;;  %v769_v22 = vmax.f32 %v705_v38, 0.0  ;;  %v726_v29 = vadd.f32 %v2192_v8, %v565_v16 }
 0x188   :  { %v717_v36 = vpop.f32.mrf.mxu1 }
 0x189   :  { %v790_v27 = vpack.c.bf16 %v769_v22, %v768_v13  ;;  %v718_v0 = vadd.f32 %v717_v36, %v557_v31  ;;  %v774_v25 = vmax.f32 %v726_v29, 0.0 }
 0x18a   :  { %v2193_v33 = vpop.f32.mrf.mxu1 }
 0x18b   :  { %v729_v4 = vadd.f32 %v2193_v33, %v568_v23  ;;  %2234 = vmatprep.mubr.bf16.mxu1 %v790_v27  ;;  %v772_v41 = vmax.f32 %v718_v0, 0.0 }
 0x18c   :  { %v720_v21 = vpop.f32.mrf.mxu1  ;;  %2235 = vmatmul.mubr.bf16.gmra.mxu1 %v791_v15 }
 0x18d   :  { %v775_v26 = vmax.f32 %v729_v4, 0.0  ;;  %v721_v39 = vadd.f32 %v720_v21, %v560_v37 }
 0x18e   :  { %v2196_v50 = vpop.f32.mrf.mxu1 }
 0x18f   :  { %v793_v52 = vpack.c.bf16 %v775_v26, %v774_v25  ;;  %v773_v57 = vmax.f32 %v721_v39, 0.0  ;;  %v742_v55 = vadd.f32 %v2196_v50, %v581_v46 }
 0x190   :  { %v733_v62 = vpop.f32.mrf.mxu1 }
 0x191   :  { %v792_v53 = vpack.c.bf16 %v773_v57, %v772_v41  ;;  %v734_v11 = vadd.f32 %v733_v62, %v573_v7  ;;  %v778_v5 = vmax.f32 %v742_v55, 0.0 }
 0x192   :  { %v2197_v43 = vpop.f32.mrf.mxu1 }
 0x193   :  { %v745_v20 = vadd.f32 %v2197_v43, %v584_v40  ;;  %2238 = vmatprep.mubr.bf16.mxu1 %v792_v53  ;;  %v776_v42 = vmax.f32 %v734_v11, 0.0 }
 0x194   :  { %v736_v60 = vpop.f32.mrf.mxu1  ;;  %2239 = vmatmul.mubr.bf16.gmra.mxu1 %v793_v52 }
 0x195   :  { %v737_v3 = vadd.f32 %v736_v60, %v576_v24  ;;  %v779_v61 = vmax.f32 %v745_v20, 0.0 }
 0x197   :  { %v777_v44 = vmax.f32 %v737_v3, 0.0  ;;  %v795_v2 = vpack.c.bf16 %v779_v61, %v778_v5 }
 0x199   :  { %v794_v47 = vpack.c.bf16 %v777_v44, %v776_v42 }
 0x19b   :  { %2242 = vmatprep.mubr.bf16.mxu1 %v794_v47 }
 0x19c   :  { %2243 = vmatmul.mubr.bf16.gmra.mxu1 %v795_v2 }
 0x224   :  { %v2216_v12 = vpop.f32.mrf.mxu1 }
 0x225   :  { %v910_v35 = vadd.f32 %v2216_v12, %v2856_v56 }
 0x226   :  { %v901_v34 = vpop.f32.mrf.mxu1 }
 0x227   :  { %v902_v45 = vadd.f32 %v2856_v56, %v901_v34  ;;  %v1030_v49 = vmax.f32 %v910_v35, 0.0 }
 0x228   :  { %v2217_v59 = vpop.f32.mrf.mxu1 }
 0x229   :  { %v1028_v63 = vmax.f32 %v902_v45, 0.0  ;;  %v913_v58 = vadd.f32 %v2217_v59, %v2856_v56 }
 0x22a   :  { %v904_v48 = vpop.f32.mrf.mxu1 }
 0x22b   :  { %v905_v51 = vadd.f32 %v2856_v56, %v904_v48  ;;  %v1031_v10 = vmax.f32 %v913_v58, 0.0 }
 0x22c   :  { %v2220_v9 = vpop.f32.mrf.mxu1 }
 0x22d   :  { %v1029_v1 = vmax.f32 %v905_v51, 0.0  ;;  %v1061_v30 = vpack.c.bf16 %v1031_v10, %v1030_v49  ;;  %v926_v31 = vadd.f32 %v2220_v9, %v2856_v56 }
 0x22e   :  { %v917_v6 = vpop.f32.mrf.mxu1 }
 0x22f   :  { %v1060_v14 = vpack.c.bf16 %v1029_v1, %v1028_v63  ;;  %v918_v13 = vadd.f32 %v2856_v56, %v917_v6  ;;  %v1034_v0 = vmax.f32 %v926_v31, 0.0 }
 0x230   :  { %v2221_v18 = vpop.f32.mrf.mxu1 }
 0x231   :  { %1217 = vmatmul.mubr.bf16.vlgmr.msra.gmra.mxu0 %v1060_v14  ;;  %v1032_v16 = vmax.f32 %v918_v13, 0.0  ;;  %v929_v36 = vadd.f32 %v2221_v18, %v2856_v56 }
 0x232   :  { %1226 = vmatprep.mubr.bf16.mxu0 %v2642_v32  ;;  %v920_v17 = vpop.f32.mrf.mxu1 }
 0x233   :  { %v921_v38 = vadd.f32 %v2856_v56, %v920_v17  ;;  %v1035_v23 = vmax.f32 %v929_v36, 0.0 }
 0x234   :  { %v2224_v8 = vpop.f32.mrf.mxu1 }
 0x235   :  { %v1033_v15 = vmax.f32 %v921_v38, 0.0  ;;  %v1063_v4 = vpack.c.bf16 %v1035_v23, %v1034_v0  ;;  %v942_v50 = vadd.f32 %v2224_v8, %v2856_v56 }
 0x236   :  { %v933_v22 = vpop.f32.mrf.mxu1 }
 0x237   :  { %v1062_v27 = vpack.c.bf16 %v1033_v15, %v1032_v16  ;;  %v934_v37 = vadd.f32 %v2856_v56, %v933_v22  ;;  %v1038_v62 = vmax.f32 %v942_v50, 0.0 }
 0x238   :  { %v2225_v29 = vpop.f32.mrf.mxu1 }
 0x239   :  { %1227 = vmatmul.mubr.bf16.gmra.mxu0 %v1061_v30  ;;  %v1036_v25 = vmax.f32 %v934_v37, 0.0  ;;  %v945_v41 = vadd.f32 %v2225_v29, %v2856_v56 }
 0x23a   :  { %1236 = vmatprep.mubr.bf16.mxu0 %v2642_v32  ;;  %v936_v33 = vpop.f32.mrf.mxu1 }
 0x23b   :  { %v937_v21 = vadd.f32 %v2856_v56, %v936_v33  ;;  %v1039_v53 = vmax.f32 %v945_v41, 0.0 }
 0x23c   :  { %v2228_v54 = vpop.f32.mrf.mxu1 }
 0x23d   :  { %v1037_v26 = vmax.f32 %v937_v21, 0.0  ;;  %v1065_v40 = vpack.c.bf16 %v1039_v53, %v1038_v62  ;;  %v958_v60 = vadd.f32 %v2228_v54, %v2856_v56 }
 0x23e   :  { %v949_v39 = vpop.f32.mrf.mxu1 }
 0x23f   :  { %v1064_v52 = vpack.c.bf16 %v1037_v26, %v1036_v25  ;;  %v950_v46 = vadd.f32 %v2856_v56, %v949_v39  ;;  %v1042_v44 = vmax.f32 %v958_v60, 0.0 }
 0x240   :  { %v2229_v57 = vpop.f32.mrf.mxu1 }
 0x241   :  { %1237 = vmatmul.mubr.bf16.gmra.mxu0 %v1062_v27  ;;  %v1040_v20 = vmax.f32 %v950_v46, 0.0  ;;  %v961_v3 = vadd.f32 %v2229_v57, %v2856_v56 }
 0x242   :  { %1246 = vmatprep.mubr.bf16.mxu0 %v2642_v32  ;;  %v952_v7 = vpop.f32.mrf.mxu1 }
 0x243   :  { %v953_v43 = vadd.f32 %v2856_v56, %v952_v7  ;;  %v1043_v5 = vmax.f32 %v961_v3, 0.0 }
 0x244   :  { %v2232_v11 = vpop.f32.mrf.mxu1 }
 0x245   :  { %v1041_v24 = vmax.f32 %v953_v43, 0.0  ;;  %v1067_v2 = vpack.c.bf16 %v1043_v5, %v1042_v44  ;;  %v974_v63 = vadd.f32 %v2232_v11, %v2856_v56 }
 0x246   :  { %v965_v55 = vpop.f32.mrf.mxu1 }
 0x247   :  { %v1066_v61 = vpack.c.bf16 %v1041_v24, %v1040_v20  ;;  %v966_v12 = vadd.f32 %v2856_v56, %v965_v55  ;;  %v1046_v58 = vmax.f32 %v974_v63, 0.0  ;;  %v1094_v24 = vlaneseq }
 0x248   :  { %v2233_v42 = vpop.f32.mrf.mxu1 }
 0x249   :  { %1247 = vmatmul.mubr.bf16.gmra.mxu0 %v1063_v4  ;;  %v1044_v45 = vmax.f32 %v966_v12, 0.0  ;;  %v977_v48 = vadd.f32 %v2233_v42, %v2856_v56  ;;  %v1095_v55 = vshrl.u32 %v1094_v24, 7 }
 0x24a   :  { %1256 = vmatprep.mubr.bf16.mxu0 %v2642_v32  ;;  %v968_v47 = vpop.f32.mrf.mxu1 }
 0x24b   :  { %v969_v19 = vadd.f32 %v2856_v56, %v968_v47  ;;  %v1047_v1 = vmax.f32 %v977_v48, 0.0  ;;  %v1096_v60 = vsub.s32 0, %v1095_v55  ;;  %v1100_v3 = vsub.s32 1, %v1095_v55 }
 0x24c   :  { %v2236_v28 = vpop.f32.mrf.mxu1 }
 0x24d   :  { %v1045_v34 = vmax.f32 %v969_v19, 0.0  ;;  %v1069_v14 = vpack.c.bf16 %v1047_v1, %v1046_v58  ;;  %v990_v15 = vadd.f32 %v2236_v28, %v2856_v56 }
 0x24e   :  { %v981_v59 = vpop.f32.mrf.mxu1 }
 0x24f   :  { %v1068_v51 = vpack.c.bf16 %v1045_v34, %v1044_v45  ;;  %v982_v10 = vadd.f32 %v2856_v56, %v981_v59  ;;  %v1050_v36 = vmax.f32 %v990_v15, 0.0 }
 0x250   :  { %v2237_v9 = vpop.f32.mrf.mxu1 }
 0x251   :  { %1257 = vmatmul.mubr.bf16.gmra.mxu0 %v1064_v52  ;;  %v1048_v30 = vmax.f32 %v982_v10, 0.0  ;;  %v993_v38 = vadd.f32 %v2237_v9, %v2856_v56 }
 0x252   :  { %1266 = vmatprep.mubr.bf16.mxu0 %v2642_v32  ;;  %v984_v6 = vpop.f32.mrf.mxu1 }
 0x253   :  { %v985_v18 = vadd.f32 %v2856_v56, %v984_v6  ;;  %v1051_v22 = vmax.f32 %v993_v38, 0.0 }
 0x254   :  { %v2240_v35 = vpop.f32.mrf.mxu1 }
 0x255   :  { %v1049_v17 = vmax.f32 %v985_v18, 0.0  ;;  %v1071_v27 = vpack.c.bf16 %v1051_v22, %v1050_v36  ;;  %v1006_v25 = vadd.f32 %v2240_v35, %v2856_v56 }
 0x256   :  { %v997_v49 = vpop.f32.mrf.mxu1 }
 0x257   :  { %v1070_v8 = vpack.c.bf16 %v1049_v17, %v1048_v30  ;;  %v998_v23 = vadd.f32 %v2856_v56, %v997_v49  ;;  %v1054_v50 = vmax.f32 %v1006_v25, 0.0 }
 0x258   :  { %v2241_v13 = vpop.f32.mrf.mxu1 }
 0x259   :  { %1267 = vmatmul.mubr.bf16.gmra.mxu0 %v1065_v40  ;;  %v1052_v4 = vmax.f32 %v998_v23, 0.0  ;;  %v1009_v37 = vadd.f32 %v2241_v13, %v2856_v56 }
 0x25a   :  { %1276 = vmatprep.mubr.bf16.mxu0 %v2642_v32  ;;  %v1000_v16 = vpop.f32.mrf.mxu1 }
 0x25b   :  { %v1001_v29 = vadd.f32 %v2856_v56, %v1000_v16  ;;  %v1055_v26 = vmax.f32 %v1009_v37, 0.0 }
 0x25c   :  { %v2244_v31 = vpop.f32.mrf.mxu1 }
 0x25d   :  { %v1053_v33 = vmax.f32 %v1001_v29, 0.0  ;;  %v1073_v41 = vpack.c.bf16 %v1055_v26, %v1054_v50  ;;  %v1022_v46 = vadd.f32 %v2244_v31, %v2856_v56 }
 0x25e   :  { %v1013_v0 = vpop.f32.mrf.mxu1 }
 0x25f   :  { %v1072_v21 = vpack.c.bf16 %v1053_v33, %v1052_v4  ;;  %v1014_v57 = vadd.f32 %v2856_v56, %v1013_v0  ;;  %v1058_v11 = vmax.f32 %v1022_v46, 0.0 }
 0x260   :  { %v2245_v54 = vpop.f32.mrf.mxu1 }
 0x261   :  { %1277 = vmatmul.mubr.bf16.gmra.mxu0 %v1066_v61  ;;  %v1056_v53 = vmax.f32 %v1014_v57, 0.0  ;;  %v1025_v7 = vadd.f32 %v2245_v54, %v2856_v56  ;;  %v1092_v61 = vld [vmem:[%s3497_s6] sm:$0x3]  ;;  %s2643_s6 = smov [#allocation10]  }
 0x262   :  { %1286 = vmatprep.mubr.bf16.mxu0 %v2642_v32  ;;  %v1016_v39 = vpop.f32.mrf.mxu1  ;;  %v2908_v42 = vrot.slane %v1092_v61, %v1096_v60  ;;  %v2910_v44 = vrot.slane %v1092_v61, %v1100_v3  ;;  %s1926_s27 = sshll.u32 %s2643_s6, 4  ;;  %s1927_s27 = int_to_ptr.vmem [resolvable:$true] %s1926_s27 }
 0x263   :  { %v1017_v52 = vadd.f32 %v2856_v56, %v1016_v39  ;;  %v1059_v43 = vmax.f32 %v1025_v7, 0.0  ;;  %s2604_s28 = scalar_lea.vmem %s1927_s27, 8192  ;;  %p2609_p7 = scmp.lt.s32.totalorder %s1927_s27, %s1927_s27 }
 0x264   :  { %p2605_p6 = scmp.ne.s32.totalorder %s1927_s27, %s2604_s28  ;;  %p2610_p8 = scmp.lt.s32.totalorder %s2604_s28, %s2604_s28 }
 0x265   :  { %v1057_v62 = vmax.f32 %v1017_v52, 0.0  ;;  %v1075_v20 = vpack.c.bf16 %v1059_v43, %v1058_v11 }
 0x266   :  { %p2611_p9 = por %p2610_p8, %p2609_p7 }
 0x267   :  { %v1074_v40 = vpack.c.bf16 %v1057_v62, %v1056_v53 }
 0x268   :  { %p2612_p10 = pnand %p2611_p9, %p2605_p6 }
 0x269   :  { %1287 = vmatmul.mubr.bf16.gmra.mxu0 %v1067_v2 }
 0x26a   :  { %1296 = vmatprep.mubr.bf16.mxu0 %v2642_v32 }
 0x271   :  { %1297 = vmatmul.mubr.bf16.gmra.mxu0 %v1068_v51 }
 0x272   :  { %1306 = vmatprep.mubr.bf16.mxu0 %v2642_v32 }
 0x279   :  { %1307 = vmatmul.mubr.bf16.gmra.mxu0 %v1069_v14 }
 0x27a   :  { %1316 = vmatprep.mubr.bf16.mxu0 %v2642_v32 }
 0x281   :  { %1317 = vmatmul.mubr.bf16.gmra.mxu0 %v1070_v8 }
 0x282   :  { %1326 = vmatprep.mubr.bf16.mxu0 %v2642_v32 }
 0x289   :  { %1327 = vmatmul.mubr.bf16.gmra.mxu0 %v1071_v27 }
 0x28a   :  { %1336 = vmatprep.mubr.bf16.mxu0 %v2642_v32 }
 0x291   :  { %1337 = vmatmul.mubr.bf16.gmra.mxu0 %v1072_v21 }
 0x292   :  { %1346 = vmatprep.mubr.bf16.mxu0 %v2642_v32 }
 0x299   :  { %1347 = vmatmul.mubr.bf16.gmra.mxu0 %v1073_v41 }
 0x29a   :  { %1356 = vmatprep.mubr.bf16.mxu0 %v2642_v32 }
 0x2a1   :  { %1357 = vmatmul.mubr.bf16.gmra.mxu0 %v1074_v40 }
 0x2a2   :  { %1366 = vmatprep.mubr.bf16.mxu0 %v2642_v32 }
 0x2a9   :  { %1367 = vmatmul.mubr.bf16.gmra.mxu0 %v1075_v20 }
 0x2f1   :  { %v1218_v56 = vpop.f32.mrf.mxu0 }
 0x2f2   :  { %v2913_v32 = vadd.f32 %v1218_v56, %v2908_v42 }
 0x2f3   :  { %v1220_v5 = vpop.f32.mrf.mxu0 }
 0x2f4   :  { %v2916_v47 = vadd.f32 %v1220_v5, %v2910_v44 }
 0x2f5   :  { %v1222_v2 = vpop.f32.mrf.mxu0 }
 0x2f6   :  { %v1377_v19 = vmax.f32 %v2913_v32, %v2916_v47  ;;  %v2921_v12 = vadd.f32 %v1222_v2, %v2908_v42 }
 0x2f7   :  { %v1224_v28 = vpop.f32.mrf.mxu0 }
 0x2f8   :  { %v2924_v34 = vadd.f32 %v1224_v28, %v2910_v44  ;;  %1378 = vmax.xlane.f32.xlu0 %v1377_v19 }
 0x2f9   :  { %v1228_v59 = vpop.f32.mrf.mxu0 }
 0x2fa   :  { %v1380_v45 = vmax.f32 %v2921_v12, %v2924_v34  ;;  %v2929_v51 = vadd.f32 %v1228_v59, %v2908_v42 }
 0x2fb   :  { %v1230_v48 = vpop.f32.mrf.mxu0 }
 0x2fc   :  { %v2932_v9 = vadd.f32 %v1230_v48, %v2910_v44  ;;  %1381 = vmax.xlane.f32.xlu0 %v1380_v45 }
 0x2fd   :  { %v1232_v63 = vpop.f32.mrf.mxu0 }
 0x2fe   :  { %v1383_v1 = vmax.f32 %v2929_v51, %v2932_v9  ;;  %v2937_v58 = vadd.f32 %v1232_v63, %v2908_v42 }
 0x2ff   :  { %v1234_v6 = vpop.f32.mrf.mxu0 }
 0x300   :  { %v2940_v14 = vadd.f32 %v1234_v6, %v2910_v44  ;;  %1384 = vmax.xlane.f32.xlu1 %v1383_v1 }
 0x301   :  { %v1238_v18 = vpop.f32.mrf.mxu0 }
 0x302   :  { %v1386_v35 = vmax.f32 %v2937_v58, %v2940_v14  ;;  %v2945_v17 = vadd.f32 %v1238_v18, %v2908_v42 }
 0x303   :  { %v1240_v10 = vpop.f32.mrf.mxu0 }
 0x304   :  { %v2948_v49 = vadd.f32 %v1240_v10, %v2910_v44  ;;  %1387 = vmax.xlane.f32.xlu1 %v1386_v35 }
 0x305   :  { %v1242_v30 = vpop.f32.mrf.mxu0 }
 0x306   :  { %v1389_v38 = vmax.f32 %v2945_v17, %v2948_v49  ;;  %v2953_v13 = vadd.f32 %v1242_v30, %v2908_v42 }
 0x307   :  { %v1244_v8 = vpop.f32.mrf.mxu0 }
 0x308   :  { %v2956_v15 = vadd.f32 %v1244_v8, %v2910_v44  ;;  %1390 = vmax.xlane.f32.xlu0 %v1389_v38 }
 0x309   :  { %v1248_v22 = vpop.f32.mrf.mxu0 }
 0x30a   :  { %v1392_v16 = vmax.f32 %v2953_v13, %v2956_v15  ;;  %v2961_v27 = vadd.f32 %v1248_v22, %v2908_v42 }
 0x30b   :  { %v1250_v36 = vpop.f32.mrf.mxu0 }
 0x30c   :  { %v2964_v29 = vadd.f32 %v1250_v36, %v2910_v44  ;;  %1393 = vmax.xlane.f32.xlu1 %v1392_v16 }
 0x30d   :  { %v1252_v31 = vpop.f32.mrf.mxu0 }
 0x30e   :  { %v1395_v23 = vmax.f32 %v2961_v27, %v2964_v29  ;;  %v2969_v0 = vadd.f32 %v1252_v31, %v2908_v42 }
 0x30f   :  { %v1254_v33 = vpop.f32.mrf.mxu0 }
 0x310   :  { %v2972_v4 = vadd.f32 %v1254_v33, %v2910_v44  ;;  %1396 = vmax.xlane.f32.xlu0 %v1395_v23 }
 0x311   :  { %v1258_v37 = vpop.f32.mrf.mxu0 }
 0x312   :  { %v1398_v21 = vmax.f32 %v2969_v0, %v2972_v4  ;;  %v2977_v25 = vadd.f32 %v1258_v37, %v2908_v42 }
 0x313   :  { %v1260_v54 = vpop.f32.mrf.mxu0 }
 0x314   :  { %v2980_v26 = vadd.f32 %v1260_v54, %v2910_v44  ;;  %1399 = vmax.xlane.f32.xlu1 %v1398_v21 }
 0x315   :  { %v1262_v39 = vpop.f32.mrf.mxu0 }
 0x316   :  { %v1401_v50 = vmax.f32 %v2977_v25, %v2980_v26  ;;  %v2985_v52 = vadd.f32 %v1262_v39, %v2908_v42 }
 0x317   :  { %v1264_v41 = vpop.f32.mrf.mxu0 }
 0x318   :  { %v2988_v57 = vadd.f32 %v1264_v41, %v2910_v44  ;;  %1402 = vmax.xlane.f32.xlu0 %v1401_v50 }
 0x319   :  { %v1268_v62 = vpop.f32.mrf.mxu0 }
 0x31a   :  { %v1404_v53 = vmax.f32 %v2985_v52, %v2988_v57  ;;  %v2993_v40 = vadd.f32 %v1268_v62, %v2908_v42 }
 0x31b   :  { %v1270_v7 = vpop.f32.mrf.mxu0 }
 0x31c   :  { %v2996_v46 = vadd.f32 %v1270_v7, %v2910_v44  ;;  %1405 = vmax.xlane.f32.xlu1 %v1404_v53 }
 0x31d   :  { %v1272_v43 = vpop.f32.mrf.mxu0 }
 0x31e   :  { %v1407_v11 = vmax.f32 %v2993_v40, %v2996_v46  ;;  %v3001_v24 = vadd.f32 %v1272_v43, %v2908_v42 }
 0x31f   :  { %v1274_v20 = vpop.f32.mrf.mxu0 }
 0x320   :  { %v3004_v55 = vadd.f32 %v1274_v20, %v2910_v44  ;;  %1408 = vmax.xlane.f32.xlu0 %v1407_v11 }
 0x321   :  { %v1278_v60 = vpop.f32.mrf.mxu0 }
 0x322   :  { %v1410_v3 = vmax.f32 %v3001_v24, %v3004_v55  ;;  %v3009_v56 = vadd.f32 %v1278_v60, %v2908_v42 }
 0x323   :  { %v1280_v61 = vpop.f32.mrf.mxu0 }
 0x324   :  { %v3012_v5 = vadd.f32 %v1280_v61, %v2910_v44  ;;  %1411 = vmax.xlane.f32.xlu1 %v1410_v3 }
 0x325   :  { %v1282_v2 = vpop.f32.mrf.mxu0 }
 0x326   :  { %v1413_v19 = vmax.f32 %v3009_v56, %v3012_v5  ;;  %v3017_v59 = vadd.f32 %v1282_v2, %v2908_v42 }
 0x327   :  { %v1284_v28 = vpop.f32.mrf.mxu0 }
 0x328   :  { %v3020_v45 = vadd.f32 %v1284_v28, %v2910_v44  ;;  %1414 = vmax.xlane.f32.xlu0 %v1413_v19 }
 0x329   :  { %v1288_v48 = vpop.f32.mrf.mxu0 }
 0x32a   :  { %v1416_v63 = vmax.f32 %v3017_v59, %v3020_v45  ;;  %v3025_v6 = vadd.f32 %v1288_v48, %v2908_v42 }
 0x32b   :  { %v1290_v1 = vpop.f32.mrf.mxu0 }
 0x32c   :  { %v3028_v18 = vadd.f32 %v1290_v1, %v2910_v44  ;;  %1417 = vmax.xlane.f32.xlu1 %v1416_v63 }
 0x32d   :  { %v1292_v35 = vpop.f32.mrf.mxu0 }
 0x32e   :  { %v1419_v10 = vmax.f32 %v3025_v6, %v3028_v18  ;;  %v3033_v38 = vadd.f32 %v1292_v35, %v2908_v42 }
 0x32f   :  { %v1294_v30 = vpop.f32.mrf.mxu0 }
 0x330   :  { %v3036_v8 = vadd.f32 %v1294_v30, %v2910_v44  ;;  %1420 = vmax.xlane.f32.xlu0 %v1419_v10 }
 0x331   :  { %v1298_v22 = vpop.f32.mrf.mxu0 }
 0x332   :  { %v1422_v16 = vmax.f32 %v3033_v38, %v3036_v8  ;;  %v3041_v31 = vadd.f32 %v1298_v22, %v2908_v42 }
 0x333   :  { %v1300_v36 = vpop.f32.mrf.mxu0 }
 0x334   :  { %v3044_v23 = vadd.f32 %v1300_v36, %v2910_v44  ;;  %1423 = vmax.xlane.f32.xlu1 %v1422_v16 }
 0x335   :  { %v1302_v33 = vpop.f32.mrf.mxu0 }
 0x336   :  { %v1425_v37 = vmax.f32 %v3041_v31, %v3044_v23  ;;  %v3049_v54 = vadd.f32 %v1302_v33, %v2908_v42 }
 0x337   :  { %v1304_v21 = vpop.f32.mrf.mxu0 }
 0x338   :  { %v3052_v39 = vadd.f32 %v1304_v21, %v2910_v44  ;;  %1426 = vmax.xlane.f32.xlu0 %v1425_v37 }
 0x339   :  { %v1308_v50 = vpop.f32.mrf.mxu0 }
 0x33a   :  { %v1428_v41 = vmax.f32 %v3049_v54, %v3052_v39  ;;  %v3057_v53 = vadd.f32 %v1308_v50, %v2908_v42 }
 0x33b   :  { %v1310_v62 = vpop.f32.mrf.mxu0 }
 0x33c   :  { %v3060_v7 = vadd.f32 %v1310_v62, %v2910_v44  ;;  %1429 = vmax.xlane.f32.xlu1 %v1428_v41 }
 0x33d   :  { %v1312_v43 = vpop.f32.mrf.mxu0 }
 0x33e   :  { %v1431_v11 = vmax.f32 %v3057_v53, %v3060_v7  ;;  %v3065_v60 = vadd.f32 %v1312_v43, %v2908_v42 }
 0x33f   :  { %v1314_v20 = vpop.f32.mrf.mxu0 }
 0x340   :  { %v3068_v3 = vadd.f32 %v1314_v20, %v2910_v44  ;;  %1432 = vmax.xlane.f32.xlu0 %v1431_v11 }
 0x341   :  { %v1318_v61 = vpop.f32.mrf.mxu0 }
 0x342   :  { %v1434_v2 = vmax.f32 %v3065_v60, %v3068_v3  ;;  %v3073_v28 = vadd.f32 %v1318_v61, %v2908_v42 }
 0x343   :  { %v1320_v19 = vpop.f32.mrf.mxu0 }
 0x344   :  { %v3076_v48 = vadd.f32 %v1320_v19, %v2910_v44  ;;  %1435 = vmax.xlane.f32.xlu1 %v1434_v2 }
 0x345   :  { %v1322_v63 = vpop.f32.mrf.mxu0 }
 0x346   :  { %v1437_v1 = vmax.f32 %v3073_v28, %v3076_v48  ;;  %v3081_v10 = vadd.f32 %v1322_v63, %v2908_v42 }
 0x347   :  { %v1324_v35 = vpop.f32.mrf.mxu0 }
 0x348   :  { %v3084_v30 = vadd.f32 %v1324_v35, %v2910_v44  ;;  %1438 = vmax.xlane.f32.xlu0 %v1437_v1 }
 0x349   :  { %v1328_v22 = vpop.f32.mrf.mxu0 }
 0x34a   :  { %v1440_v16 = vmax.f32 %v3081_v10, %v3084_v30  ;;  %v3089_v33 = vadd.f32 %v1328_v22, %v2908_v42 }
 0x34b   :  { %v1330_v36 = vpop.f32.mrf.mxu0 }
 0x34c   :  { %v3092_v37 = vadd.f32 %v1330_v36, %v2910_v44  ;;  %1441 = vmax.xlane.f32.xlu1 %v1440_v16 }
 0x34d   :  { %v1332_v21 = vpop.f32.mrf.mxu0 }
 0x34e   :  { %v1443_v50 = vmax.f32 %v3089_v33, %v3092_v37  ;;  %v3097_v62 = vadd.f32 %v1332_v21, %v2908_v42 }
 0x34f   :  { %v1334_v41 = vpop.f32.mrf.mxu0 }
 0x350   :  { %v3100_v43 = vadd.f32 %v1334_v41, %v2910_v44  ;;  %1444 = vmax.xlane.f32.xlu0 %v1443_v50 }
 0x351   :  { %v1338_v11 = vpop.f32.mrf.mxu0 }
 0x352   :  { %v1446_v20 = vmax.f32 %v3097_v62, %v3100_v43  ;;  %v3105_v2 = vadd.f32 %v1338_v11, %v2908_v42 }
 0x353   :  { %v1340_v61 = vpop.f32.mrf.mxu0 }
 0x354   :  { %v3108_v19 = vadd.f32 %v1340_v61, %v2910_v44  ;;  %1447 = vmax.xlane.f32.xlu1 %v1446_v20 }
 0x355   :  { %v1342_v63 = vpop.f32.mrf.mxu0 }
 0x356   :  { %3523 = vst [vmem:[#allocation15_spill] sm:$0xff] %v3108_v19  ;;  %v1449_v1 = vmax.f32 %v3105_v2, %v3108_v19  ;;  %v3113_v22 = vadd.f32 %v1342_v63, %v2908_v42 }
 0x357   :  { %v1344_v35 = vpop.f32.mrf.mxu0 }
 0x358   :  { %3524 = vst [vmem:[#allocation16_spill] sm:$0xff] %v3113_v22  ;;  %v3116_v16 = vadd.f32 %v1344_v35, %v2910_v44  ;;  %1450 = vmax.xlane.f32.xlu0 %v1449_v1 }
 0x359   :  { %v1348_v36 = vpop.f32.mrf.mxu0 }
 0x35a   :  { %3525 = vst [vmem:[#allocation17_spill] sm:$0xff] %v3116_v16  ;;  %v1452_v21 = vmax.f32 %v3113_v22, %v3116_v16  ;;  %v3121_v41 = vadd.f32 %v1348_v36, %v2908_v42 }
 0x35b   :  { %v1350_v50 = vpop.f32.mrf.mxu0 }
 0x35c   :  { %3526 = vst [vmem:[#allocation18_spill] sm:$0xff] %v3121_v41  ;;  %v3124_v11 = vadd.f32 %v1350_v50, %v2910_v44  ;;  %1453 = vmax.xlane.f32.xlu1 %v1452_v21 }
 0x35d   :  { %v1352_v20 = vpop.f32.mrf.mxu0 }
 0x35e   :  { %3527 = vst [vmem:[#allocation19_spill] sm:$0xff] %v3124_v11  ;;  %v1455_v61 = vmax.f32 %v3121_v41, %v3124_v11  ;;  %v3129_v35 = vadd.f32 %v1352_v20, %v2908_v42 }
 0x35f   :  { %v1354_v63 = vpop.f32.mrf.mxu0 }
 0x360   :  { %3528 = vst [vmem:[#allocation20_spill] sm:$0xff] %v3129_v35  ;;  %v3132_v1 = vadd.f32 %v1354_v63, %v2910_v44  ;;  %1456 = vmax.xlane.f32.xlu0 %v1455_v61 }
 0x361   :  { %v1358_v16 = vpop.f32.mrf.mxu0 }
 0x362   :  { %3529 = vst [vmem:[#allocation21_spill] sm:$0xff] %v3132_v1  ;;  %v1458_v36 = vmax.f32 %v3129_v35, %v3132_v1  ;;  %v3137_v50 = vadd.f32 %v1358_v16, %v2908_v42 }
 0x363   :  { %v1360_v22 = vpop.f32.mrf.mxu0 }
 0x364   :  { %3530 = vst [vmem:[#allocation22_spill] sm:$0xff] %v3137_v50  ;;  %v3140_v21 = vadd.f32 %v1360_v22, %v2910_v44  ;;  %1459 = vmax.xlane.f32.xlu1 %v1458_v36 }
 0x365   :  { %v1362_v11 = vpop.f32.mrf.mxu0 }
 0x366   :  { %3531 = vst [vmem:[#allocation23_spill] sm:$0xff] %v3140_v21  ;;  %v1461_v20 = vmax.f32 %v3137_v50, %v3140_v21  ;;  %v3145_v63 = vadd.f32 %v1362_v11, %v2908_v42 }
 0x367   :  { %v1364_v41 = vpop.f32.mrf.mxu0 }
 0x368   :  { %3532 = vst [vmem:[#allocation24_spill] sm:$0xff] %v3145_v63  ;;  %v3148_v61 = vadd.f32 %v1364_v41, %v2910_v44  ;;  %1462 = vmax.xlane.f32.xlu0 %v1461_v20 }
 0x369   :  { %v1368_v1 = vpop.f32.mrf.mxu0 }
 0x36a   :  { %3533 = vst [vmem:[#allocation25_spill] sm:$0xff] %v3148_v61  ;;  %v1464_v16 = vmax.f32 %v3145_v63, %v3148_v61  ;;  %v3153_v22 = vadd.f32 %v1368_v1, %v2908_v42 }
 0x36b   :  { %v1370_v35 = vpop.f32.mrf.mxu0 }
 0x36c   :  { %v3156_v36 = vadd.f32 %v1370_v35, %v2910_v44  ;;  %1465 = vmax.xlane.f32.xlu1 %v1464_v16 }
 0x36d   :  { %v1372_v21 = vpop.f32.mrf.mxu0 }
 0x36e   :  { %3534 = vst [vmem:[#allocation26_spill] sm:$0xff] %v3156_v36  ;;  %v1467_v11 = vmax.f32 %v3153_v22, %v3156_v36  ;;  %v3161_v41 = vadd.f32 %v1372_v21, %v2908_v42 }
 0x36f   :  { %v1374_v50 = vpop.f32.mrf.mxu0 }
 0x370   :  { %v3164_v20 = vadd.f32 %v1374_v50, %v2910_v44  ;;  %1468 = vmax.xlane.f32.xlu0 %v1467_v11 }
 0x372   :  { %3535 = vst [vmem:[#allocation27_spill] sm:$0xff] %v3164_v20  ;;  %v1470_v1 = vmax.f32 %v3161_v41, %v3164_v20 }
 0x374   :  { %1471 = vmax.xlane.f32.xlu1 %v1470_v1 }
 0x381   :  { %v1379_v61 = vpop.xlane.xlu0 %1378 }
 0x382   :  { %v1473_v35 = vsub.f32 %v2913_v32, %v1379_v61  ;;  %v1474_v16 = vsub.f32 %v2916_v47, %v1379_v61 }
 0x384   :  { %v1537_v63 = vmul.f32 1.442695, %v1473_v35  ;;  %v1539_v19 = vmul.f32 1.442695, %v1474_v16 }
 0x385   :  { %v1382_v36 = vpop.xlane.xlu0 %1381 }
 0x386   :  { %2332 = vpow2.f32 %v1537_v63  ;;  %v1475_v42 = vsub.f32 %v2921_v12, %v1382_v36  ;;  %v1476_v21 = vsub.f32 %v2924_v34, %v1382_v36 }
 0x387   :  { %2334 = vpow2.f32 %v1539_v19 }
 0x388   :  { %v1541_v44 = vmul.f32 1.442695, %v1475_v42  ;;  %v1543_v50 = vmul.f32 1.442695, %v1476_v21 }
 0x389   :  { %v1385_v11 = vpop.xlane.xlu1 %1384 }
 0x38a   :  { %2336 = vpow2.f32 %v1541_v44  ;;  %v1477_v1 = vsub.f32 %v2929_v51, %v1385_v11  ;;  %v1478_v20 = vsub.f32 %v2932_v9, %v1385_v11 }
 0x38b   :  { %2338 = vpow2.f32 %v1543_v50 }
 0x38c   :  { %v1545_v32 = vmul.f32 1.442695, %v1477_v1  ;;  %v1547_v47 = vmul.f32 1.442695, %v1478_v20 }
 0x38d   :  { %v1388_v61 = vpop.xlane.xlu1 %1387 }
 0x38e   :  { %2340 = vpow2.f32 %v1545_v32  ;;  %v1479_v63 = vsub.f32 %v2937_v58, %v1388_v61  ;;  %v1480_v12 = vsub.f32 %v2940_v14, %v1388_v61 }
 0x38f   :  { %2342 = vpow2.f32 %v1547_v47 }
 0x390   :  { %v1549_v34 = vmul.f32 1.442695, %v1479_v63  ;;  %v1551_v19 = vmul.f32 1.442695, %v1480_v12 }
 0x391   :  { %v1391_v36 = vpop.xlane.xlu0 %1390 }
 0x392   :  { %2344 = vpow2.f32 %v1549_v34  ;;  %v1481_v35 = vsub.f32 %v2945_v17, %v1391_v36  ;;  %v1482_v51 = vsub.f32 %v2948_v49, %v1391_v36 }
 0x393   :  { %v3178_v16 = vpop.eup %2332  ;;  %2346 = vpow2.f32 %v1551_v19 }
 0x394   :  { %v3180_v9 = vpop.eup %2334  ;;  %v1553_v20 = vmul.f32 1.442695, %v1481_v35  ;;  %v1555_v42 = vmul.f32 1.442695, %v1482_v51 }
 0x395   :  { %v1394_v21 = vpop.xlane.xlu1 %1393  ;;  %v1665_v58 = vadd.f32 %v3180_v9, %v3178_v16 }
 0x396   :  { %2348 = vpow2.f32 %v1553_v20  ;;  %v1483_v14 = vsub.f32 %v2953_v13, %v1394_v21  ;;  %v1484_v44 = vsub.f32 %v2956_v15, %v1394_v21 }
 0x397   :  { %v3186_v50 = vpop.eup %2336  ;;  %2350 = vpow2.f32 %v1555_v42  ;;  %1666 = vadd.xlane.f32.xlu0 %v1665_v58 }
 0x398   :  { %v3188_v17 = vpop.eup %2338  ;;  %v1557_v49 = vmul.f32 1.442695, %v1483_v14  ;;  %v1559_v11 = vmul.f32 1.442695, %v1484_v44 }
 0x399   :  { %v1397_v1 = vpop.xlane.xlu0 %1396  ;;  %v1668_v32 = vadd.f32 %v3188_v17, %v3186_v50 }
 0x39a   :  { %2352 = vpow2.f32 %v1557_v49  ;;  %v1485_v47 = vsub.f32 %v2961_v27, %v1397_v1  ;;  %v1486_v61 = vsub.f32 %v2964_v29, %v1397_v1 }
 0x39b   :  { %v3194_v13 = vpop.eup %2340  ;;  %2354 = vpow2.f32 %v1559_v11  ;;  %1669 = vadd.xlane.f32.xlu1 %v1668_v32 }
 0x39c   :  { %v3196_v15 = vpop.eup %2342  ;;  %v1561_v63 = vmul.f32 1.442695, %v1485_v47  ;;  %v1563_v12 = vmul.f32 1.442695, %v1486_v61 }
 0x39d   :  { %v1400_v34 = vpop.xlane.xlu1 %1399  ;;  %v1671_v19 = vadd.f32 %v3196_v15, %v3194_v13 }
 0x39e   :  { %2356 = vpow2.f32 %v1561_v63  ;;  %v1487_v36 = vsub.f32 %v2969_v0, %v1400_v34  ;;  %v1488_v35 = vsub.f32 %v2972_v4, %v1400_v34 }
 0x39f   :  { %v3202_v27 = vpop.eup %2344  ;;  %2358 = vpow2.f32 %v1563_v12  ;;  %1672 = vadd.xlane.f32.xlu0 %v1671_v19 }
 0x3a0   :  { %v3204_v29 = vpop.eup %2346  ;;  %v1565_v51 = vmul.f32 1.442695, %v1487_v36  ;;  %v1567_v20 = vmul.f32 1.442695, %v1488_v35 }
 0x3a1   :  { %v1403_v42 = vpop.xlane.xlu0 %1402  ;;  %v1674_v21 = vadd.f32 %v3204_v29, %v3202_v27 }
 0x3a2   :  { %2360 = vpow2.f32 %v1565_v51  ;;  %v1489_v58 = vsub.f32 %v2977_v25, %v1403_v42  ;;  %v1490_v14 = vsub.f32 %v2980_v26, %v1403_v42 }
 0x3a3   :  { %v3210_v0 = vpop.eup %2348  ;;  %2362 = vpow2.f32 %v1567_v20  ;;  %1675 = vadd.xlane.f32.xlu1 %v1674_v21 }
 0x3a4   :  { %v3212_v4 = vpop.eup %2350  ;;  %v1569_v44 = vmul.f32 1.442695, %v1489_v58  ;;  %v1571_v49 = vmul.f32 1.442695, %v1490_v14 }
 0x3a5   :  { %v1406_v11 = vpop.xlane.xlu1 %1405  ;;  %v1677_v1 = vadd.f32 %v3212_v4, %v3210_v0 }
 0x3a6   :  { %2364 = vpow2.f32 %v1569_v44  ;;  %v1491_v32 = vsub.f32 %v2985_v52, %v1406_v11  ;;  %v1492_v47 = vsub.f32 %v2988_v57, %v1406_v11 }
 0x3a7   :  { %v3218_v25 = vpop.eup %2352  ;;  %2366 = vpow2.f32 %v1571_v49  ;;  %1678 = vadd.xlane.f32.xlu0 %v1677_v1 }
 0x3a8   :  { %v3220_v26 = vpop.eup %2354  ;;  %v1573_v61 = vmul.f32 1.442695, %v1491_v32  ;;  %v1575_v63 = vmul.f32 1.442695, %v1492_v47 }
 0x3a9   :  { %v1409_v12 = vpop.xlane.xlu0 %1408  ;;  %v1680_v34 = vadd.f32 %v3220_v26, %v3218_v25 }
 0x3aa   :  { %2368 = vpow2.f32 %v1573_v61  ;;  %v1493_v19 = vsub.f32 %v2993_v40, %v1409_v12  ;;  %v1494_v36 = vsub.f32 %v2996_v46, %v1409_v12 }
 0x3ab   :  { %v3226_v52 = vpop.eup %2356  ;;  %2370 = vpow2.f32 %v1575_v63  ;;  %1681 = vadd.xlane.f32.xlu1 %v1680_v34 }
 0x3ac   :  { %v3228_v57 = vpop.eup %2358  ;;  %v1577_v35 = vmul.f32 1.442695, %v1493_v19  ;;  %v1579_v51 = vmul.f32 1.442695, %v1494_v36 }
 0x3ad   :  { %v1412_v20 = vpop.xlane.xlu1 %1411  ;;  %v1683_v42 = vadd.f32 %v3228_v57, %v3226_v52 }
 0x3ae   :  { %2372 = vpow2.f32 %v1577_v35  ;;  %v1495_v21 = vsub.f32 %v3001_v24, %v1412_v20  ;;  %v1496_v58 = vsub.f32 %v3004_v55, %v1412_v20 }
 0x3af   :  { %v3234_v40 = vpop.eup %2360  ;;  %2374 = vpow2.f32 %v1579_v51  ;;  %1684 = vadd.xlane.f32.xlu0 %v1683_v42 }
 0x3b0   :  { %v3236_v46 = vpop.eup %2362  ;;  %v1581_v14 = vmul.f32 1.442695, %v1495_v21  ;;  %v1583_v44 = vmul.f32 1.442695, %v1496_v58 }
 0x3b1   :  { %v1415_v49 = vpop.xlane.xlu0 %1414  ;;  %v1686_v11 = vadd.f32 %v3236_v46, %v3234_v40 }
 0x3b2   :  { %2376 = vpow2.f32 %v1581_v14  ;;  %v1497_v1 = vsub.f32 %v3009_v56, %v1415_v49  ;;  %v1498_v32 = vsub.f32 %v3012_v5, %v1415_v49 }
 0x3b3   :  { %v3242_v24 = vpop.eup %2364  ;;  %2378 = vpow2.f32 %v1583_v44  ;;  %1687 = vadd.xlane.f32.xlu1 %v1686_v11 }
 0x3b4   :  { %v3244_v55 = vpop.eup %2366  ;;  %v1585_v47 = vmul.f32 1.442695, %v1497_v1  ;;  %v1587_v61 = vmul.f32 1.442695, %v1498_v32 }
 0x3b5   :  { %v1418_v63 = vpop.xlane.xlu1 %1417  ;;  %v1689_v12 = vadd.f32 %v3244_v55, %v3242_v24 }
 0x3b6   :  { %2380 = vpow2.f32 %v1585_v47  ;;  %v1499_v34 = vsub.f32 %v3017_v59, %v1418_v63  ;;  %v1500_v19 = vsub.f32 %v3020_v45, %v1418_v63 }
 0x3b7   :  { %v3250_v56 = vpop.eup %2368  ;;  %2382 = vpow2.f32 %v1587_v61  ;;  %1690 = vadd.xlane.f32.xlu0 %v1689_v12 }
 0x3b8   :  { %v3252_v5 = vpop.eup %2370  ;;  %v1589_v36 = vmul.f32 1.442695, %v1499_v34  ;;  %v1591_v35 = vmul.f32 1.442695, %v1500_v19 }
 0x3b9   :  { %v1421_v51 = vpop.xlane.xlu0 %1420  ;;  %v1692_v20 = vadd.f32 %v3252_v5, %v3250_v56 }
 0x3ba   :  { %2384 = vpow2.f32 %v1589_v36  ;;  %v1501_v42 = vsub.f32 %v3025_v6, %v1421_v51  ;;  %v1502_v21 = vsub.f32 %v3028_v18, %v1421_v51 }
 0x3bb   :  { %v3258_v59 = vpop.eup %2372  ;;  %2386 = vpow2.f32 %v1591_v35  ;;  %1693 = vadd.xlane.f32.xlu1 %v1692_v20 }
 0x3bc   :  { %v3260_v45 = vpop.eup %2374  ;;  %v1593_v58 = vmul.f32 1.442695, %v1501_v42  ;;  %v1595_v14 = vmul.f32 1.442695, %v1502_v21 }
 0x3bd   :  { %v1424_v44 = vpop.xlane.xlu1 %1423  ;;  %v1695_v49 = vadd.f32 %v3260_v45, %v3258_v59 }
 0x3be   :  { %2388 = vpow2.f32 %v1593_v58  ;;  %v1503_v11 = vsub.f32 %v3033_v38, %v1424_v44  ;;  %v1504_v1 = vsub.f32 %v3036_v8, %v1424_v44 }
 0x3bf   :  { %v3266_v6 = vpop.eup %2376  ;;  %2390 = vpow2.f32 %v1595_v14  ;;  %1696 = vadd.xlane.f32.xlu0 %v1695_v49 }
 0x3c0   :  { %v3268_v18 = vpop.eup %2378  ;;  %v1597_v32 = vmul.f32 1.442695, %v1503_v11  ;;  %v1599_v47 = vmul.f32 1.442695, %v1504_v1 }
 0x3c1   :  { %v1427_v61 = vpop.xlane.xlu0 %1426  ;;  %v1698_v63 = vadd.f32 %v3268_v18, %v3266_v6 }
 0x3c2   :  { %2392 = vpow2.f32 %v1597_v32  ;;  %v1505_v12 = vsub.f32 %v3041_v31, %v1427_v61  ;;  %v1506_v34 = vsub.f32 %v3044_v23, %v1427_v61 }
 0x3c3   :  { %v3274_v38 = vpop.eup %2380  ;;  %2394 = vpow2.f32 %v1599_v47  ;;  %1699 = vadd.xlane.f32.xlu1 %v1698_v63 }
 0x3c4   :  { %v3276_v8 = vpop.eup %2382  ;;  %v1601_v19 = vmul.f32 1.442695, %v1505_v12  ;;  %v1603_v36 = vmul.f32 1.442695, %v1506_v34 }
 0x3c5   :  { %v1430_v35 = vpop.xlane.xlu1 %1429  ;;  %v1701_v51 = vadd.f32 %v3276_v8, %v3274_v38 }
 0x3c6   :  { %2396 = vpow2.f32 %v1601_v19  ;;  %v1507_v20 = vsub.f32 %v3049_v54, %v1430_v35  ;;  %v1508_v42 = vsub.f32 %v3052_v39, %v1430_v35 }
 0x3c7   :  { %v3282_v31 = vpop.eup %2384  ;;  %2398 = vpow2.f32 %v1603_v36  ;;  %1702 = vadd.xlane.f32.xlu0 %v1701_v51 }
 0x3c8   :  { %v3284_v23 = vpop.eup %2386  ;;  %v1605_v21 = vmul.f32 1.442695, %v1507_v20  ;;  %v1607_v58 = vmul.f32 1.442695, %v1508_v42 }
 0x3c9   :  { %v1433_v14 = vpop.xlane.xlu0 %1432  ;;  %v1704_v44 = vadd.f32 %v3284_v23, %v3282_v31 }
 0x3ca   :  { %2400 = vpow2.f32 %v1605_v21  ;;  %v1509_v49 = vsub.f32 %v3057_v53, %v1433_v14  ;;  %v1510_v11 = vsub.f32 %v3060_v7, %v1433_v14 }
 0x3cb   :  { %v3290_v54 = vpop.eup %2388  ;;  %2402 = vpow2.f32 %v1607_v58  ;;  %1705 = vadd.xlane.f32.xlu1 %v1704_v44 }
 0x3cc   :  { %v3292_v39 = vpop.eup %2390  ;;  %v1609_v1 = vmul.f32 1.442695, %v1509_v49  ;;  %v1611_v32 = vmul.f32 1.442695, %v1510_v11 }
 0x3cd   :  { %v1436_v47 = vpop.xlane.xlu1 %1435  ;;  %v1707_v61 = vadd.f32 %v3292_v39, %v3290_v54 }
 0x3ce   :  { %2404 = vpow2.f32 %v1609_v1  ;;  %v1511_v63 = vsub.f32 %v3065_v60, %v1436_v47  ;;  %v1512_v12 = vsub.f32 %v3068_v3, %v1436_v47 }
 0x3cf   :  { %v3298_v53 = vpop.eup %2392  ;;  %2406 = vpow2.f32 %v1611_v32  ;;  %1708 = vadd.xlane.f32.xlu0 %v1707_v61 }
 0x3d0   :  { %v3300_v7 = vpop.eup %2394  ;;  %v1613_v34 = vmul.f32 1.442695, %v1511_v63  ;;  %v1615_v19 = vmul.f32 1.442695, %v1512_v12 }
 0x3d1   :  { %v1439_v36 = vpop.xlane.xlu0 %1438  ;;  %v1710_v35 = vadd.f32 %v3300_v7, %v3298_v53 }
 0x3d2   :  { %2408 = vpow2.f32 %v1613_v34  ;;  %v1513_v51 = vsub.f32 %v3073_v28, %v1439_v36  ;;  %v1514_v20 = vsub.f32 %v3076_v48, %v1439_v36 }
 0x3d3   :  { %v3306_v60 = vpop.eup %2396  ;;  %2410 = vpow2.f32 %v1615_v19  ;;  %1711 = vadd.xlane.f32.xlu1 %v1710_v35 }
 0x3d4   :  { %v3308_v3 = vpop.eup %2398  ;;  %v1617_v42 = vmul.f32 1.442695, %v1513_v51  ;;  %v1619_v21 = vmul.f32 1.442695, %v1514_v20 }
 0x3d5   :  { %v1442_v58 = vpop.xlane.xlu1 %1441  ;;  %v1713_v14 = vadd.f32 %v3308_v3, %v3306_v60 }
 0x3d6   :  { %2412 = vpow2.f32 %v1617_v42  ;;  %v1515_v44 = vsub.f32 %v3081_v10, %v1442_v58  ;;  %v1516_v49 = vsub.f32 %v3084_v30, %v1442_v58 }
 0x3d7   :  { %v3314_v28 = vpop.eup %2400  ;;  %2414 = vpow2.f32 %v1619_v21  ;;  %1714 = vadd.xlane.f32.xlu0 %v1713_v14 }
 0x3d8   :  { %v3316_v48 = vpop.eup %2402  ;;  %v1621_v11 = vmul.f32 1.442695, %v1515_v44  ;;  %v1623_v1 = vmul.f32 1.442695, %v1516_v49  ;;  %v3536_v44 = vld [vmem:[#allocation15_spill] sm:$0xff] }
 0x3d9   :  { %v1445_v32 = vpop.xlane.xlu0 %1444  ;;  %v1716_v47 = vadd.f32 %v3316_v48, %v3314_v28 }
 0x3da   :  { %2416 = vpow2.f32 %v1621_v11  ;;  %v1517_v61 = vsub.f32 %v3089_v33, %v1445_v32  ;;  %v1518_v63 = vsub.f32 %v3092_v37, %v1445_v32 }
 0x3db   :  { %v3322_v10 = vpop.eup %2404  ;;  %2418 = vpow2.f32 %v1623_v1  ;;  %1717 = vadd.xlane.f32.xlu1 %v1716_v47 }
 0x3dc   :  { %v3324_v30 = vpop.eup %2406  ;;  %v1625_v12 = vmul.f32 1.442695, %v1517_v61  ;;  %v1627_v34 = vmul.f32 1.442695, %v1518_v63  ;;  %v3537_v61 = vld [vmem:[#allocation16_spill] sm:$0xff] }
 0x3dd   :  { %v1448_v19 = vpop.xlane.xlu1 %1447  ;;  %v1719_v36 = vadd.f32 %v3324_v30, %v3322_v10 }
 0x3de   :  { %2420 = vpow2.f32 %v1625_v12  ;;  %v1519_v35 = vsub.f32 %v3097_v62, %v1448_v19  ;;  %v1520_v51 = vsub.f32 %v3100_v43, %v1448_v19  ;;  %v3538_v12 = vld [vmem:[#allocation17_spill] sm:$0xff] }
 0x3df   :  { %v3330_v33 = vpop.eup %2408  ;;  %2422 = vpow2.f32 %v1627_v34  ;;  %1720 = vadd.xlane.f32.xlu0 %v1719_v36 }
 0x3e0   :  { %v3332_v37 = vpop.eup %2410  ;;  %v1629_v20 = vmul.f32 1.442695, %v1519_v35  ;;  %v1631_v42 = vmul.f32 1.442695, %v1520_v51 }
 0x3e1   :  { %v1451_v21 = vpop.xlane.xlu0 %1450  ;;  %v1722_v58 = vadd.f32 %v3332_v37, %v3330_v33 }
 0x3e2   :  { %2424 = vpow2.f32 %v1629_v20  ;;  %v1521_v14 = vsub.f32 %v3105_v2, %v1451_v21  ;;  %v1522_v49 = vsub.f32 %v3536_v44, %v1451_v21 }
 0x3e3   :  { %v3338_v62 = vpop.eup %2412  ;;  %2426 = vpow2.f32 %v1631_v42  ;;  %1723 = vadd.xlane.f32.xlu1 %v1722_v58  ;;  %v3539_v42 = vld [vmem:[#allocation18_spill] sm:$0xff]  ;;  %v3540_v58 = vld [vmem:[#allocation19_spill] sm:$0xff] }
 0x3e4   :  { %v3340_v43 = vpop.eup %2414  ;;  %v1633_v11 = vmul.f32 1.442695, %v1521_v14  ;;  %v1635_v1 = vmul.f32 1.442695, %v1522_v49 }
 0x3e5   :  { %v1454_v32 = vpop.xlane.xlu1 %1453  ;;  %v1725_v47 = vadd.f32 %v3340_v43, %v3338_v62 }
 0x3e6   :  { %2428 = vpow2.f32 %v1633_v11  ;;  %v1523_v63 = vsub.f32 %v3537_v61, %v1454_v32  ;;  %v1524_v34 = vsub.f32 %v3538_v12, %v1454_v32  ;;  %v3542_v61 = vld [vmem:[#allocation20_spill] sm:$0xff]  ;;  %v3543_v12 = vld [vmem:[#allocation21_spill] sm:$0xff] }
 0x3e7   :  { %v3346_v2 = vpop.eup %2416  ;;  %2430 = vpow2.f32 %v1635_v1  ;;  %1726 = vadd.xlane.f32.xlu0 %v1725_v47 }
 0x3e8   :  { %v3348_v19 = vpop.eup %2418  ;;  %v1637_v36 = vmul.f32 1.442695, %v1523_v63  ;;  %v1639_v35 = vmul.f32 1.442695, %v1524_v34 }
 0x3e9   :  { %v1457_v51 = vpop.xlane.xlu0 %1456  ;;  %v1728_v20 = vadd.f32 %v3348_v19, %v3346_v2 }
 0x3ea   :  { %2432 = vpow2.f32 %v1637_v36  ;;  %v1525_v21 = vsub.f32 %v3539_v42, %v1457_v51  ;;  %v1526_v14 = vsub.f32 %v3540_v58, %v1457_v51  ;;  %v3546_v58 = vld [vmem:[#allocation22_spill] sm:$0xff] }
 0x3eb   :  { %v3354_v44 = vpop.eup %2420  ;;  %2434 = vpow2.f32 %v1639_v35  ;;  %1729 = vadd.xlane.f32.xlu1 %v1728_v20 }
 0x3ec   :  { %v3356_v49 = vpop.eup %2422  ;;  %v1641_v11 = vmul.f32 1.442695, %v1525_v21  ;;  %v1643_v1 = vmul.f32 1.442695, %v1526_v14 }
 0x3ed   :  { %3541 = vst [vmem:[#allocation15_spill] sm:$0xff] %v3356_v49  ;;  %v1460_v32 = vpop.xlane.xlu1 %1459  ;;  %v1731_v47 = vadd.f32 %v3356_v49, %v3354_v44 }
 0x3ee   :  { %2436 = vpow2.f32 %v1641_v11  ;;  %v1527_v63 = vsub.f32 %v3542_v61, %v1460_v32  ;;  %v1528_v34 = vsub.f32 %v3543_v12, %v1460_v32  ;;  %v3547_v11 = vld [vmem:[#allocation23_spill] sm:$0xff] }
 0x3ef   :  { %v3362_v36 = vpop.eup %2424  ;;  %2438 = vpow2.f32 %v1643_v1  ;;  %1732 = vadd.xlane.f32.xlu0 %v1731_v47 }
 0x3f0   :  { %3544 = vst [vmem:[#allocation16_spill] sm:$0xff] %v3362_v36  ;;  %v3364_v51 = vpop.eup %2426  ;;  %v1645_v35 = vmul.f32 1.442695, %v1527_v63  ;;  %v1647_v20 = vmul.f32 1.442695, %v1528_v34  ;;  %v3549_v34 = vld [vmem:[#allocation24_spill] sm:$0xff] }
 0x3f1   :  { %3545 = vst [vmem:[#allocation17_spill] sm:$0xff] %v3364_v51  ;;  %v1463_v42 = vpop.xlane.xlu0 %1462  ;;  %v1734_v21 = vadd.f32 %v3364_v51, %v3362_v36 }
 0x3f2   :  { %2440 = vpow2.f32 %v1645_v35  ;;  %v1529_v14 = vsub.f32 %v3546_v58, %v1463_v42  ;;  %v1530_v49 = vsub.f32 %v3547_v11, %v1463_v42  ;;  %v3550_v35 = vld [vmem:[#allocation25_spill] sm:$0xff] }
 0x3f3   :  { %v3370_v61 = vpop.eup %2428  ;;  %2442 = vpow2.f32 %v1647_v20  ;;  %1735 = vadd.xlane.f32.xlu1 %v1734_v21 }
 0x3f4   :  { %v3372_v32 = vpop.eup %2430  ;;  %v1649_v1 = vmul.f32 1.442695, %v1529_v14  ;;  %v1651_v47 = vmul.f32 1.442695, %v1530_v49 }
 0x3f5   :  { %3548 = vst [vmem:[#allocation18_spill] sm:$0xff] %v3372_v32  ;;  %v1466_v12 = vpop.xlane.xlu1 %1465  ;;  %v1737_v63 = vadd.f32 %v3372_v32, %v3370_v61 }
 0x3f6   :  { %2444 = vpow2.f32 %v1649_v1  ;;  %v1531_v51 = vsub.f32 %v3549_v34, %v1466_v12  ;;  %v1532_v36 = vsub.f32 %v3550_v35, %v1466_v12  ;;  %v3552_v1 = vld [vmem:[#allocation26_spill] sm:$0xff] }
 0x3f7   :  { %v3378_v58 = vpop.eup %2432  ;;  %2446 = vpow2.f32 %v1651_v47  ;;  %1738 = vadd.xlane.f32.xlu0 %v1737_v63 }
 0x3f8   :  { %v3380_v42 = vpop.eup %2434  ;;  %v1653_v20 = vmul.f32 1.442695, %v1531_v51  ;;  %v1655_v21 = vmul.f32 1.442695, %v1532_v36 }
 0x3f9   :  { %3551 = vst [vmem:[#allocation19_spill] sm:$0xff] %v3380_v42  ;;  %v1469_v11 = vpop.xlane.xlu0 %1468  ;;  %v1740_v49 = vadd.f32 %v3380_v42, %v3378_v58 }
 0x3fa   :  { %2448 = vpow2.f32 %v1653_v20  ;;  %v1533_v14 = vsub.f32 %v3153_v22, %v1469_v11  ;;  %v1534_v32 = vsub.f32 %v3552_v1, %v1469_v11  ;;  %v3553_v20 = vld [vmem:[#allocation27_spill] sm:$0xff] }
 0x3fb   :  { %v3386_v34 = vpop.eup %2436  ;;  %2450 = vpow2.f32 %v1655_v21  ;;  %1741 = vadd.xlane.f32.xlu1 %v1740_v49 }
 0x3fc   :  { %v3388_v12 = vpop.eup %2438  ;;  %v1657_v47 = vmul.f32 1.442695, %v1533_v14  ;;  %v1659_v63 = vmul.f32 1.442695, %v1534_v32 }
 0x3fd   :  { %v1472_v35 = vpop.xlane.xlu1 %1471  ;;  %v1743_v36 = vadd.f32 %v3388_v12, %v3386_v34 }
 0x3fe   :  { %2452 = vpow2.f32 %v1657_v47  ;;  %v1535_v51 = vsub.f32 %v3161_v41, %v1472_v35  ;;  %v1536_v42 = vsub.f32 %v3553_v20, %v1472_v35 }
 0x3ff   :  { %v3394_v22 = vpop.eup %2440  ;;  %2454 = vpow2.f32 %v1659_v63  ;;  %1744 = vadd.xlane.f32.xlu0 %v1743_v36 }
 0x400   :  { %v3396_v11 = vpop.eup %2442  ;;  %v1661_v21 = vmul.f32 1.442695, %v1535_v51  ;;  %v1663_v49 = vmul.f32 1.442695, %v1536_v42 }
 0x401   :  { %v1746_v32 = vadd.f32 %v3396_v11, %v3394_v22 }
 0x402   :  { %2456 = vpow2.f32 %v1661_v21 }
 0x403   :  { %v3400_v14 = vpop.eup %2444  ;;  %2458 = vpow2.f32 %v1663_v49  ;;  %1747 = vadd.xlane.f32.xlu1 %v1746_v32 }
 0x404   :  { %v3402_v1 = vpop.eup %2446 }
 0x405   :  { %3554 = vst [vmem:[#allocation20_spill] sm:$0xff] %v3402_v1  ;;  %v1749_v41 = vadd.f32 %v3402_v1, %v3400_v14 }
 0x407   :  { %v3406_v47 = vpop.eup %2448  ;;  %1750 = vadd.xlane.f32.xlu0 %v1749_v41 }
 0x408   :  { %3555 = vst [vmem:[#allocation21_spill] sm:$0xff] %v3406_v47  ;;  %v3408_v63 = vpop.eup %2450 }
 0x409   :  { %3556 = vst [vmem:[#allocation22_spill] sm:$0xff] %v3408_v63  ;;  %v1752_v42 = vadd.f32 %v3408_v63, %v3406_v47 }
 0x40b   :  { %v3412_v35 = vpop.eup %2452  ;;  %1753 = vadd.xlane.f32.xlu1 %v1752_v42 }
 0x40c   :  { %3557 = vst [vmem:[#allocation23_spill] sm:$0xff] %v3412_v35  ;;  %v3414_v36 = vpop.eup %2454 }
 0x40d   :  { %3558 = vst [vmem:[#allocation24_spill] sm:$0xff] %v3414_v36  ;;  %v1755_v51 = vadd.f32 %v3414_v36, %v3412_v35 }
 0x40f   :  { %v3418_v20 = vpop.eup %2456  ;;  %1756 = vadd.xlane.f32.xlu0 %v1755_v51 }
 0x410   :  { %v3420_v21 = vpop.eup %2458 }
 0x411   :  { %3559 = vst [vmem:[#allocation25_spill] sm:$0xff] %v3420_v21  ;;  %v1758_v49 = vadd.f32 %v3420_v21, %v3418_v20 }
 0x413   :  { %1759 = vadd.xlane.f32.xlu1 %v1758_v49 }
 0x420   :  { %v1667_v32 = vpop.xlane.xlu0 %1666 }
 0x421   :  { %2460 = vrcp.f32 %v1667_v32 }
 0x424   :  { %v1670_v41 = vpop.xlane.xlu1 %1669 }
 0x425   :  { %2462 = vrcp.f32 %v1670_v41 }
 0x428   :  { %v1673_v63 = vpop.xlane.xlu0 %1672 }
 0x429   :  { %2464 = vrcp.f32 %v1673_v63 }
 0x42c   :  { %v1676_v42 = vpop.xlane.xlu1 %1675 }
 0x42d   :  { %2466 = vrcp.f32 %v1676_v42 }
 0x42e   :  { %v2461_v47 = vpop.eup %2460 }
 0x42f   :  { %v1793_v36 = vmul.f32 %v2461_v47, %v3178_v16  ;;  %v1794_v35 = vmul.f32 %v2461_v47, %v3180_v9 }
 0x430   :  { %v1679_v51 = vpop.xlane.xlu0 %1678 }
 0x431   :  { %1857 = vst [vmem:[#allocation10] sm:$0xff] %v1793_v36  ;;  %1858 = vst [vmem:[#allocation10 + $0x8] sm:$0xff] %v1794_v35  ;;  %2468 = vrcp.f32 %v1679_v51 }
 0x432   :  { %v2463_v1 = vpop.eup %2462 }
 0x433   :  { %v1795_v49 = vmul.f32 %v2463_v1, %v3186_v50  ;;  %v1796_v32 = vmul.f32 %v2463_v1, %v3188_v17 }
 0x434   :  { %v1682_v21 = vpop.xlane.xlu1 %1681 }
 0x435   :  { %1859 = vst [vmem:[#allocation10 + $0x10] sm:$0xff] %v1795_v49  ;;  %1860 = vst [vmem:[#allocation10 + $0x18] sm:$0xff] %v1796_v32  ;;  %2470 = vrcp.f32 %v1682_v21 }
 0x436   :  { %v2465_v63 = vpop.eup %2464 }
 0x437   :  { %v1797_v41 = vmul.f32 %v2465_v63, %v3194_v13  ;;  %v1798_v16 = vmul.f32 %v2465_v63, %v3196_v15 }
 0x438   :  { %v1685_v42 = vpop.xlane.xlu0 %1684 }
 0x439   :  { %1861 = vst [vmem:[#allocation10 + $0x20] sm:$0xff] %v1797_v41  ;;  %1862 = vst [vmem:[#allocation10 + $0x28] sm:$0xff] %v1798_v16  ;;  %2472 = vrcp.f32 %v1685_v42 }
 0x43a   :  { %v2467_v9 = vpop.eup %2466 }
 0x43b   :  { %v1799_v47 = vmul.f32 %v2467_v9, %v3202_v27  ;;  %v1800_v50 = vmul.f32 %v2467_v9, %v3204_v29 }
 0x43c   :  { %v1688_v35 = vpop.xlane.xlu1 %1687 }
 0x43d   :  { %1863 = vst [vmem:[#allocation10 + $0x30] sm:$0xff] %v1799_v47  ;;  %1864 = vst [vmem:[#allocation10 + $0x38] sm:$0xff] %v1800_v50  ;;  %2474 = vrcp.f32 %v1688_v35 }
 0x43e   :  { %v2469_v17 = vpop.eup %2468 }
 0x43f   :  { %v1801_v1 = vmul.f32 %v2469_v17, %v3210_v0  ;;  %v1802_v13 = vmul.f32 %v2469_v17, %v3212_v4 }
 0x440   :  { %v1691_v36 = vpop.xlane.xlu0 %1690 }
 0x441   :  { %1865 = vst [vmem:[#allocation10 + $0x40] sm:$0xff] %v1801_v1  ;;  %1866 = vst [vmem:[#allocation10 + $0x48] sm:$0xff] %v1802_v13  ;;  %2476 = vrcp.f32 %v1691_v36 }
 0x442   :  { %v2471_v15 = vpop.eup %2470 }
 0x443   :  { %v1803_v21 = vmul.f32 %v2471_v15, %v3218_v25  ;;  %v1804_v27 = vmul.f32 %v2471_v15, %v3220_v26 }
 0x444   :  { %v1694_v51 = vpop.xlane.xlu1 %1693 }
 0x445   :  { %1867 = vst [vmem:[#allocation10 + $0x50] sm:$0xff] %v1803_v21  ;;  %1868 = vst [vmem:[#allocation10 + $0x58] sm:$0xff] %v1804_v27  ;;  %2478 = vrcp.f32 %v1694_v51 }
 0x446   :  { %v2473_v29 = vpop.eup %2472 }
 0x447   :  { %v1805_v49 = vmul.f32 %v2473_v29, %v3226_v52  ;;  %v1806_v0 = vmul.f32 %v2473_v29, %v3228_v57 }
 0x448   :  { %v1697_v32 = vpop.xlane.xlu0 %1696 }
 0x449   :  { %1869 = vst [vmem:[#allocation10 + $0x60] sm:$0xff] %v1805_v49  ;;  %1870 = vst [vmem:[#allocation10 + $0x68] sm:$0xff] %v1806_v0  ;;  %2480 = vrcp.f32 %v1697_v32 }
 0x44a   :  { %v2475_v4 = vpop.eup %2474 }
 0x44b   :  { %v1807_v63 = vmul.f32 %v2475_v4, %v3234_v40  ;;  %v1808_v25 = vmul.f32 %v2475_v4, %v3236_v46 }
 0x44c   :  { %v1700_v41 = vpop.xlane.xlu1 %1699 }
 0x44d   :  { %1871 = vst [vmem:[#allocation10 + $0x70] sm:$0xff] %v1807_v63  ;;  %1872 = vst [vmem:[#allocation10 + $0x78] sm:$0xff] %v1808_v25  ;;  %2482 = vrcp.f32 %v1700_v41 }
 0x44e   :  { %v2477_v26 = vpop.eup %2476 }
 0x44f   :  { %v1809_v16 = vmul.f32 %v2477_v26, %v3242_v24  ;;  %v1810_v52 = vmul.f32 %v2477_v26, %v3244_v55 }
 0x450   :  { %v1703_v42 = vpop.xlane.xlu0 %1702 }
 0x451   :  { %1873 = vst [vmem:[#allocation10 + $0x80] sm:$0xff] %v1809_v16  ;;  %1874 = vst [vmem:[#allocation10 + $0x88] sm:$0xff] %v1810_v52  ;;  %2484 = vrcp.f32 %v1703_v42 }
 0x452   :  { %v2479_v57 = vpop.eup %2478 }
 0x453   :  { %v1811_v9 = vmul.f32 %v2479_v57, %v3250_v56  ;;  %v1812_v40 = vmul.f32 %v2479_v57, %v3252_v5 }
 0x454   :  { %v1706_v47 = vpop.xlane.xlu1 %1705 }
 0x455   :  { %1875 = vst [vmem:[#allocation10 + $0x90] sm:$0xff] %v1811_v9  ;;  %1876 = vst [vmem:[#allocation10 + $0x98] sm:$0xff] %v1812_v40  ;;  %2486 = vrcp.f32 %v1706_v47  ;;  %v3560_v47 = vld [vmem:[#allocation15_spill] sm:$0xff] }
 0x456   :  { %v2481_v46 = vpop.eup %2480 }
 0x457   :  { %v1813_v50 = vmul.f32 %v2481_v46, %v3258_v59  ;;  %v1814_v24 = vmul.f32 %v2481_v46, %v3260_v45 }
 0x458   :  { %v1709_v35 = vpop.xlane.xlu0 %1708 }
 0x459   :  { %1877 = vst [vmem:[#allocation10 + $0xa0] sm:$0xff] %v1813_v50  ;;  %1878 = vst [vmem:[#allocation10 + $0xa8] sm:$0xff] %v1814_v24  ;;  %2488 = vrcp.f32 %v1709_v35  ;;  %v3561_v50 = vld [vmem:[#allocation16_spill] sm:$0xff]  ;;  %v3562_v35 = vld [vmem:[#allocation17_spill] sm:$0xff] }
 0x45a   :  { %v2483_v55 = vpop.eup %2482 }
 0x45b   :  { %v1815_v17 = vmul.f32 %v2483_v55, %v3266_v6  ;;  %v1816_v56 = vmul.f32 %v2483_v55, %v3268_v18 }
 0x45c   :  { %v1712_v1 = vpop.xlane.xlu1 %1711 }
 0x45d   :  { %1879 = vst [vmem:[#allocation10 + $0xb0] sm:$0xff] %v1815_v17  ;;  %1880 = vst [vmem:[#allocation10 + $0xb8] sm:$0xff] %v1816_v56  ;;  %2490 = vrcp.f32 %v1712_v1  ;;  %v3563_v56 = vld [vmem:[#allocation18_spill] sm:$0xff] }
 0x45e   :  { %v2485_v5 = vpop.eup %2484 }
 0x45f   :  { %v1817_v13 = vmul.f32 %v2485_v5, %v3274_v38  ;;  %v1818_v59 = vmul.f32 %v2485_v5, %v3276_v8 }
 0x460   :  { %v1715_v36 = vpop.xlane.xlu0 %1714 }
 0x461   :  { %1881 = vst [vmem:[#allocation10 + $0xc0] sm:$0xff] %v1817_v13  ;;  %1882 = vst [vmem:[#allocation10 + $0xc8] sm:$0xff] %v1818_v59  ;;  %2492 = vrcp.f32 %v1715_v36  ;;  %v3564_v59 = vld [vmem:[#allocation19_spill] sm:$0xff] }
 0x462   :  { %v2487_v45 = vpop.eup %2486 }
 0x463   :  { %v1819_v15 = vmul.f32 %v2487_v45, %v3282_v31  ;;  %v1820_v6 = vmul.f32 %v2487_v45, %v3284_v23 }
 0x464   :  { %v1718_v21 = vpop.xlane.xlu1 %1717 }
 0x465   :  { %1883 = vst [vmem:[#allocation10 + $0xd0] sm:$0xff] %v1819_v15  ;;  %1884 = vst [vmem:[#allocation10 + $0xd8] sm:$0xff] %v1820_v6  ;;  %2494 = vrcp.f32 %v1718_v21 }
 0x466   :  { %v2489_v18 = vpop.eup %2488 }
 0x467   :  { %v1821_v27 = vmul.f32 %v2489_v18, %v3290_v54  ;;  %v1822_v38 = vmul.f32 %v2489_v18, %v3292_v39 }
 0x468   :  { %v1721_v51 = vpop.xlane.xlu0 %1720 }
 0x469   :  { %1885 = vst [vmem:[#allocation10 + $0xe0] sm:$0xff] %v1821_v27  ;;  %1886 = vst [vmem:[#allocation10 + $0xe8] sm:$0xff] %v1822_v38  ;;  %2496 = vrcp.f32 %v1721_v51 }
 0x46a   :  { %v2491_v8 = vpop.eup %2490 }
 0x46b   :  { %v1823_v29 = vmul.f32 %v2491_v8, %v3298_v53  ;;  %v1824_v31 = vmul.f32 %v2491_v8, %v3300_v7 }
 0x46c   :  { %v1724_v49 = vpop.xlane.xlu1 %1723 }
 0x46d   :  { %1887 = vst [vmem:[#allocation10 + $0xf0] sm:$0xff] %v1823_v29  ;;  %1888 = vst [vmem:[#allocation10 + $0xf8] sm:$0xff] %v1824_v31  ;;  %2498 = vrcp.f32 %v1724_v49  ;;  %v3565_v29 = vld [vmem:[#allocation20_spill] sm:$0xff]  ;;  %v3566_v31 = vld [vmem:[#allocation21_spill] sm:$0xff] }
 0x46e   :  { %v2493_v23 = vpop.eup %2492 }
 0x46f   :  { %v1825_v0 = vmul.f32 %v2493_v23, %v3306_v60  ;;  %v1826_v54 = vmul.f32 %v2493_v23, %v3308_v3  ;;  %v3567_v23 = vld [vmem:[#allocation22_spill] sm:$0xff] }
 0x470   :  { %v1727_v32 = vpop.xlane.xlu0 %1726 }
 0x471   :  { %1889 = vst [vmem:[#allocation10 + $0x100] sm:$0xff] %v1825_v0  ;;  %1890 = vst [vmem:[#allocation10 + $0x108] sm:$0xff] %v1826_v54  ;;  %2500 = vrcp.f32 %v1727_v32  ;;  %v3569_v32 = vld [vmem:[#allocation24_spill] sm:$0xff] }
 0x472   :  { %v2495_v39 = vpop.eup %2494 }
 0x473   :  { %v1827_v4 = vmul.f32 %v2495_v39, %v3314_v28  ;;  %v1828_v53 = vmul.f32 %v2495_v39, %v3316_v48 }
 0x474   :  { %v1730_v63 = vpop.xlane.xlu1 %1729 }
 0x475   :  { %1891 = vst [vmem:[#allocation10 + $0x110] sm:$0xff] %v1827_v4  ;;  %1892 = vst [vmem:[#allocation10 + $0x118] sm:$0xff] %v1828_v53  ;;  %2502 = vrcp.f32 %v1730_v63  ;;  %v3570_v53 = vld [vmem:[#allocation25_spill] sm:$0xff] }
 0x476   :  { %v2497_v7 = vpop.eup %2496 }
 0x477   :  { %v1829_v25 = vmul.f32 %v2497_v7, %v3322_v10  ;;  %v1830_v60 = vmul.f32 %v2497_v7, %v3324_v30 }
 0x478   :  { %v1733_v41 = vpop.xlane.xlu0 %1732 }
 0x479   :  { %1893 = vst [vmem:[#allocation10 + $0x120] sm:$0xff] %v1829_v25  ;;  %1894 = vst [vmem:[#allocation10 + $0x128] sm:$0xff] %v1830_v60  ;;  %2504 = vrcp.f32 %v1733_v41 }
 0x47a   :  { %v2499_v3 = vpop.eup %2498 }
 0x47b   :  { %v1831_v26 = vmul.f32 %v2499_v3, %v3330_v33  ;;  %v1832_v28 = vmul.f32 %v2499_v3, %v3332_v37 }
 0x47c   :  { %v1736_v16 = vpop.xlane.xlu1 %1735 }
 0x47d   :  { %1895 = vst [vmem:[#allocation10 + $0x130] sm:$0xff] %v1831_v26  ;;  %1896 = vst [vmem:[#allocation10 + $0x138] sm:$0xff] %v1832_v28  ;;  %2506 = vrcp.f32 %v1736_v16 }
 0x47e   :  { %v2501_v48 = vpop.eup %2500 }
 0x47f   :  { %v1833_v52 = vmul.f32 %v2501_v48, %v3338_v62  ;;  %v1834_v10 = vmul.f32 %v2501_v48, %v3340_v43 }
 0x480   :  { %v1739_v42 = vpop.xlane.xlu0 %1738 }
 0x481   :  { %1897 = vst [vmem:[#allocation10 + $0x140] sm:$0xff] %v1833_v52  ;;  %1898 = vst [vmem:[#allocation10 + $0x148] sm:$0xff] %v1834_v10  ;;  %2508 = vrcp.f32 %v1739_v42 }
 0x482   :  { %v2503_v30 = vpop.eup %2502 }
 0x483   :  { %v1835_v57 = vmul.f32 %v2503_v30, %v3346_v2  ;;  %v1836_v33 = vmul.f32 %v2503_v30, %v3348_v19 }
 0x484   :  { %v1742_v9 = vpop.xlane.xlu1 %1741 }
 0x485   :  { %1899 = vst [vmem:[#allocation10 + $0x150] sm:$0xff] %v1835_v57  ;;  %1900 = vst [vmem:[#allocation10 + $0x158] sm:$0xff] %v1836_v33  ;;  %2510 = vrcp.f32 %v1742_v9 }
 0x486   :  { %v2505_v37 = vpop.eup %2504 }
 0x487   :  { %v1837_v40 = vmul.f32 %v2505_v37, %v3354_v44  ;;  %v1838_v62 = vmul.f32 %v2505_v37, %v3560_v47 }
 0x488   :  { %v1745_v46 = vpop.xlane.xlu0 %1744 }
 0x489   :  { %1901 = vst [vmem:[#allocation10 + $0x160] sm:$0xff] %v1837_v40  ;;  %1902 = vst [vmem:[#allocation10 + $0x168] sm:$0xff] %v1838_v62  ;;  %2512 = vrcp.f32 %v1745_v46 }
 0x48a   :  { %v2507_v43 = vpop.eup %2506 }
 0x48b   :  { %v1839_v24 = vmul.f32 %v2507_v43, %v3561_v50  ;;  %v1840_v2 = vmul.f32 %v2507_v43, %v3562_v35 }
 0x48c   :  { %v1748_v55 = vpop.xlane.xlu1 %1747 }
 0x48d   :  { %1903 = vst [vmem:[#allocation10 + $0x170] sm:$0xff] %v1839_v24  ;;  %1904 = vst [vmem:[#allocation10 + $0x178] sm:$0xff] %v1840_v2  ;;  %2514 = vrcp.f32 %v1748_v55 }
 0x48e   :  { %v2509_v19 = vpop.eup %2508 }
 0x48f   :  { %v1841_v17 = vmul.f32 %v2509_v19, %v3370_v61  ;;  %v1842_v44 = vmul.f32 %v2509_v19, %v3563_v56 }
 0x490   :  { %v1751_v1 = vpop.xlane.xlu0 %1750 }
 0x491   :  { %1905 = vst [vmem:[#allocation10 + $0x180] sm:$0xff] %v1841_v17  ;;  %1906 = vst [vmem:[#allocation10 + $0x188] sm:$0xff] %v1842_v44  ;;  %2516 = vrcp.f32 %v1751_v1 }
 0x492   :  { %v2511_v5 = vpop.eup %2510 }
 0x493   :  { %v1843_v13 = vmul.f32 %v2511_v5, %v3378_v58  ;;  %v1844_v36 = vmul.f32 %v2511_v5, %v3564_v59 }
 0x494   :  { %v1754_v45 = vpop.xlane.xlu1 %1753 }
 0x495   :  { %1907 = vst [vmem:[#allocation10 + $0x190] sm:$0xff] %v1843_v13  ;;  %1908 = vst [vmem:[#allocation10 + $0x198] sm:$0xff] %v1844_v36  ;;  %2518 = vrcp.f32 %v1754_v45 }
 0x496   :  { %v2513_v15 = vpop.eup %2512 }
 0x497   :  { %v1845_v6 = vmul.f32 %v2513_v15, %v3386_v34  ;;  %v1846_v61 = vmul.f32 %v2513_v15, %v3388_v12 }
 0x498   :  { %v1757_v21 = vpop.xlane.xlu0 %1756 }
 0x499   :  { %1909 = vst [vmem:[#allocation10 + $0x1a0] sm:$0xff] %v1845_v6  ;;  %1910 = vst [vmem:[#allocation10 + $0x1a8] sm:$0xff] %v1846_v61  ;;  %2520 = vrcp.f32 %v1757_v21 }
 0x49a   :  { %v2515_v18 = vpop.eup %2514 }
 0x49b   :  { %v1847_v27 = vmul.f32 %v2515_v18, %v3394_v22  ;;  %v1848_v58 = vmul.f32 %v2515_v18, %v3396_v11  ;;  %v3568_v11 = vld [vmem:[#allocation23_spill] sm:$0xff] }
 0x49c   :  { %v1760_v38 = vpop.xlane.xlu1 %1759 }
 0x49d   :  { %1911 = vst [vmem:[#allocation10 + $0x1b0] sm:$0xff] %v1847_v27  ;;  %1912 = vst [vmem:[#allocation10 + $0x1b8] sm:$0xff] %v1848_v58  ;;  %2522 = vrcp.f32 %v1760_v38 }
 0x49e   :  { %v2517_v51 = vpop.eup %2516 }
 0x49f   :  { %v1849_v8 = vmul.f32 %v2517_v51, %v3400_v14  ;;  %v1850_v34 = vmul.f32 %v2517_v51, %v3565_v29 }
 0x4a1   :  { %1913 = vst [vmem:[#allocation10 + $0x1c0] sm:$0xff] %v1849_v8  ;;  %1914 = vst [vmem:[#allocation10 + $0x1c8] sm:$0xff] %v1850_v34 }
 0x4a2   :  { %v2519_v12 = vpop.eup %2518 }
 0x4a3   :  { %v1851_v49 = vmul.f32 %v2519_v12, %v3566_v31  ;;  %v1852_v0 = vmul.f32 %v2519_v12, %v3567_v23 }
 0x4a5   :  { %1915 = vst [vmem:[#allocation10 + $0x1d0] sm:$0xff] %v1851_v49  ;;  %1916 = vst [vmem:[#allocation10 + $0x1d8] sm:$0xff] %v1852_v0 }
 0x4a6   :  { %v2521_v22 = vpop.eup %2520 }
 0x4a7   :  { %v1853_v54 = vmul.f32 %v2521_v22, %v3568_v11  ;;  %v1854_v39 = vmul.f32 %v2521_v22, %v3569_v32 }
 0x4a9   :  { %1917 = vst [vmem:[#allocation10 + $0x1e0] sm:$0xff] %v1853_v54  ;;  %1918 = vst [vmem:[#allocation10 + $0x1e8] sm:$0xff] %v1854_v39 }
 0x4aa   :  { %v2523_v14 = vpop.eup %2522 }
 0x4ab   :  { %v1855_v4 = vmul.f32 %v2523_v14, %v3418_v20  ;;  %v1856_v63 = vmul.f32 %v2523_v14, %v3570_v53 }
 0x4ad   :  { %1919 = vst [vmem:[#allocation10 + $0x1f0] sm:$0xff] %v1855_v4  ;;  %1920 = vst [vmem:[#allocation10 + $0x1f8] sm:$0xff] %v1856_v63 }
 0x4ae   :  { %2615 = shalt.err (!%p2612_p10)
}
 0x4af   :  { %s2644_s29 = smov 256   ;;  %s2645_s30 = smov 16  }
 0x4b0   :  { %1932 = dma.vmem_to_hbm [thread:$0]  %s1927_s27, 8192, %s3498_s7, [#allocation4], %s2644_s29, %s2644_s29, %s2645_s30  }
 0x4b1   :  { %2630 = dma.done.wait [#allocation4], 8192  }
 0x4b2   :  { %2631 = vsyncadd [#allocation4], 4294959104 }
 0x4b3   :  { %1936 = vsyncpa [#allocation3], 1 }
 0x4b4   :  { %1937 = vsyncpa [#allocation6], 1 }
 0x4b5   :  { %1938 = vsyncpa [#allocation9], 1 }
 0x4b6   :  { %1939 = vsyncpa [#allocation4], 1 }

</bundles_post_ra>
